<compile_context>
chip_gen: v6e
topology: v6e:2x2x1
jax: 0.10.0
libtpu: 0.0.40
codegen_flags: <defaults>
</compile_context>

<pallas_src>
import math
import jax
import jax.numpy as jnp
import numpy as np
from jax.experimental import pallas as pl
from jax.experimental.pallas import tpu as pltpu


def _make_kernel(L, N, E, Ep, H):
    NL = N * L
    K1 = 5                      # conv_1 kernel size (taps)
    inv_E = 1.0 / E
    f32, bf16 = jnp.float32, jnp.bfloat16

    def kernel(x_ref, wqkv_ref, bqkv_ref, hmask_ref, wo_ref, bo_ref,
               lnw_ref, lnb_ref, w0_ref, b0_ref, w1cat_ref, cb1_ref,
               w2_ref, b2_ref, out_ref):
        # ---- lane-pad x to Ep in VMEM (HBM input stays (NL, E)) ----
        x = x_ref[...]                                              # (NL, E) f32
        if Ep > E:
            xp = jnp.concatenate([x, jnp.zeros((NL, Ep - E), f32)], axis=-1)
        else:
            xp = x
        xb = xp.astype(bf16)

        # ---- fused QKV projection (1/sqrt(HD) folded into Wq/bq in wrapper) ----
        qkv = jnp.dot(xb, wqkv_ref[...],
                      preferred_element_type=f32) + bqkv_ref[...]   # (NL, 3Ep)
        q3 = qkv[:, 0:Ep].reshape(N, L, Ep)
        k3 = qkv[:, Ep:2 * Ep].reshape(N, L, Ep)
        v3 = qkv[:, 2 * Ep:3 * Ep].reshape(N, L, Ep)

        # ---- head-batched self-attention: one score + one context matmul ----
        # Rows of the tiled Q are ordered (h, q); hmask keeps only head h's
        # feature lanes in row-block h, so one batched matmul over n produces
        # all per-head scores (no per-head MXU passes, no lane shuffles).
        hmask = hmask_ref[...]                                      # (H*L, Ep) f32
        qm = (jnp.concatenate([q3] * H, axis=1) * hmask).astype(bf16)  # (N,H*L,Ep)
        kb = k3.astype(bf16)
        vb = v3.astype(bf16)
        s = jnp.einsum('nme,nke->nmk', qm, kb,
                       preferred_element_type=f32)                  # (N, H*L, L)
        s = s - jnp.max(s, axis=-1, keepdims=True)
        p = jnp.exp(s)
        p = p * pl.reciprocal(jnp.sum(p, axis=-1, keepdims=True), approx=True)
        o = jnp.einsum('nmk,nke->nme', p.astype(bf16), vb,
                       preferred_element_type=f32)                  # (N, H*L, Ep)
        o = o * hmask                              # keep own-head lanes only
        attn3 = o[:, 0:L, :]
        for h in range(1, H):                      # VPU-only reassembly
            attn3 = attn3 + o[:, h * L:(h + 1) * L, :]
        attn = jnp.dot(attn3.reshape(NL, Ep).astype(bf16), wo_ref[...],
                       preferred_element_type=f32) + bo_ref[...]    # (NL, Ep)

        # ---- residual + LayerNorm over E (padded lanes are 0) ----
        # NOTE: single-pass E[y^2]-E[y]^2 variance in f32; fine at this scale,
        # revisit if activations ever carry |mean| >> std.
        y = xp + attn
        s1 = jnp.sum(y, axis=-1, keepdims=True)
        s2 = jnp.sum(y * y, axis=-1, keepdims=True)
        mu = s1 * inv_E
        var = s2 * inv_E - mu * mu
        yn = (y - mu) * jax.lax.rsqrt(var + 1e-5) * lnw_ref[...] + lnb_ref[...]

        # ---- conv_0 (kernel 1) + ReLU: one full-slab matmul ----
        a0 = jnp.maximum(
            jnp.dot(yn.astype(bf16), w0_ref[...], preferred_element_type=f32)
            + b0_ref[...], 0.0)                                     # (NL, Ep)
        a0b = a0.astype(bf16)

        # ---- conv_1 (kernel 5, slides over the batch axis n) as ONE im2col
        # matmul: lane-stack the 5 row-block-shifted copies of a0 and contract
        # against the tap-stacked weights; the tap sum accumulates in the MXU.
        def zrows(r):
            return jnp.zeros((r, Ep), bf16)
        cols = []
        for t in range(K1):
            d = t - 2                              # output block j reads a0[j + d]
            if d == 0:
                cols.append(a0b)
            elif N - abs(d) <= 0:
                cols.append(zrows(NL))
            elif d > 0:
                cols.append(jnp.concatenate([a0b[d * L:NL, :], zrows(d * L)],
                                            axis=0))
            else:
                cols.append(jnp.concatenate([zrows(-d * L), a0b[0:(N + d) * L, :]],
                                            axis=0))
        g = jnp.concatenate(cols, axis=-1)                           # (NL, 5*Ep)
        r1 = jnp.dot(g, w1cat_ref[...], preferred_element_type=f32)  # (NL, Ep)
        # + per-row-block bias (b1 + boundary taps on conv_0's zero padding,
        # hoisted to the wrapper), then ReLU.
        r1 = jnp.maximum(r1.reshape(N, L, Ep) + cb1_ref[...], 0.0)
        r1b = r1.reshape(NL, Ep).astype(bf16)

        # ---- conv_2 (kernel 1) + residual; single lane-dense store ----
        out_ref[...] = (jnp.dot(r1b, w2_ref[...], preferred_element_type=f32)
                        + b2_ref[...] + xp)

    return kernel


def bran_encoder_layer(src, params, nhead, padding=1):
    """src: (L, N, E) float32 -> (L, N, E) float32 (module eval-mode forward)."""
    L, N, E = src.shape
    H = nhead
    assert E % H == 0, "d_model must be divisible by nhead"
    HD = E // H
    # The boundary-term / shape algebra below hard-codes conv_0 (k=1, pad=1),
    # conv_1 (k=5, pad=1), conv_2 (k=1, pad=0): the only configuration for
    # which the module's residual shapes line up.  Fail loudly otherwise.
    assert padding == 1, "BRANEncoderLayer residual only lines up with padding=1"
    assert params["conv0_weight"].shape[-1] == 1
    assert params["conv1_weight"].shape[-1] == 5
    assert params["conv2_weight"].shape[-1] == 1
    K1 = 5
    Ep = max(128, ((E + 127) // 128) * 128)        # lane-dense feature dim
    scale = 1.0 / math.sqrt(HD)
    bf16 = jnp.bfloat16

    def padw(w):                                   # (in, out) -> (Ep, Ep), zero fill
        return jnp.pad(w, ((0, Ep - w.shape[0]), (0, Ep - w.shape[1])))

    def padb(b):                                   # (E,) -> (1, Ep), zero fill
        return jnp.pad(b.reshape(1, -1), ((0, 0), (0, Ep - b.shape[-1])))

    ipw, ipb = params["in_proj_weight"], params["in_proj_bias"]
    wq = padw(ipw[:E].T * scale)                   # fold 1/sqrt(HD) into Wq / bq
    wk = padw(ipw[E:2 * E].T)
    wv = padw(ipw[2 * E:].T)
    wqkv = jnp.concatenate([wq, wk, wv], axis=1).astype(bf16)        # (Ep, 3Ep)
    bqkv = jnp.concatenate([padb(ipb[:E] * scale), padb(ipb[E:2 * E]),
                            padb(ipb[2 * E:])], axis=1)              # (1, 3Ep)

    wo = padw(params["out_proj_weight"].T).astype(bf16)
    bo = padb(params["out_proj_bias"])
    lnw = padb(params["ln_weight"])
    lnb = padb(params["ln_bias"])
    w0 = padw(params["conv0_weight"][:, :, 0].T).astype(bf16)
    b0 = padb(params["conv0_bias"])
    w2 = padw(params["conv2_weight"][:, :, 0].T).astype(bf16)
    b2 = padb(params["conv2_bias"])

    # conv_1 tap-stacked weights (im2col RHS): (5*Ep, Ep)
    w1cat = jnp.concatenate(
        [padw(params["conv1_weight"][:, :, t].T) for t in range(K1)],
        axis=0).astype(bf16)

    # Per-output-row-block conv_1 bias = b1 + boundary taps applied to the
    # conv_0 zero-padding columns (relu(b0)).  Parameter-only -> hoisted out of
    # the kernel (removes 1-row edge matmuls from the critical path).
    relu_b0 = jnp.maximum(params["conv0_bias"], 0.0)
    b1 = params["conv1_bias"]
    rows = []
    for j in range(N):
        r = b1
        for t in {1 - j, N + 2 - j}:               # left / right padded column
            if 0 <= t < K1:
                r = r + relu_b0 @ params["conv1_weight"][:, :, t].T
        rows.append(r)
    cb1 = jnp.pad(jnp.stack(rows, axis=0),
                  ((0, 0), (0, Ep - E)))[:, None, :]                 # (N, 1, Ep)

    # head mask: row-block h keeps only head h's feature lanes (f32 for VPU).
    hm = np.zeros((H * L, Ep), np.float32)
    for h in range(H):
        hm[h * L:(h + 1) * L, h * HD:(h + 1) * HD] = 1.0
    hmask = jnp.asarray(hm)

    # batch-major flatten; feature lanes are padded to Ep inside the kernel,
    # so the HBM input slab stays (NL, E) instead of a 4x-wider padded copy.
    x = jnp.transpose(src, (1, 0, 2)).reshape(N * L, E)

    args = (x, wqkv, bqkv, hmask, wo, bo, lnw, lnb, w0, b0, w1cat, cb1, w2, b2)

    # TODO(synk): for large (L, N, E) add a grid over N-blocks (±2-block halo on
    # a0 for conv_1, full L per block for attention), mark it "parallel"
    # (megacore: v7x has 2 TensorCores) so BlockSpec pipelining overlaps the
    # HBM<->VMEM DMAs with compute, and size tiles for v7x's 64 MiB VMEM
    # (live slabs + double buffers <= ~32 MiB, vmem_limit_bytes <= ~48 MiB).
    # At the test size a single VMEM-resident block is fine.
    out = pl.pallas_call(
        _make_kernel(L, N, E, Ep, H),
        out_shape=jax.ShapeDtypeStruct((N * L, Ep), jnp.float32),
        in_specs=[pl.BlockSpec(memory_space=pltpu.MemorySpace.VMEM)
                  for _ in args],
        out_specs=pl.BlockSpec(memory_space=pltpu.MemorySpace.VMEM),
        compiler_params=pltpu.CompilerParams(vmem_limit_bytes=32 * 1024 * 1024),
    )(*args)

    return jnp.transpose(out[:, :E].reshape(N, L, E), (1, 0, 2))     # (L, N, E)


# ------------------------- pure-JAX reference -------------------------
def ref_forward(src, params, nhead):
    L, N, E = src.shape
    H, HD = nhead, E // nhead
    ipw, ipb = params["in_proj_weight"], params["in_proj_bias"]
    q = src @ ipw[:E].T + ipb[:E]
    k = src @ ipw[E:2 * E].T + ipb[E:2 * E]
    v = src @ ipw[2 * E:].T + ipb[2 * E:]
    qh = q.reshape(L, N, H, HD) * (HD ** -0.5)
    kh = k.reshape(L, N, H, HD)
    vh = v.reshape(L, N, H, HD)
    s = jnp.einsum('qnhd,knhd->nhqk', qh, kh)
    p = jax.nn.softmax(s, axis=-1)
    o = jnp.einsum('nhqk,knhd->qnhd', p, vh).reshape(L, N, E)
    attn = o @ params["out_proj_weight"].T + params["out_proj_bias"]
    y = src + attn
    mu = jnp.mean(y, axis=-1, keepdims=True)
    var = jnp.mean((y - mu) ** 2, axis=-1, keepdims=True)
    yn = (y - mu) / jnp.sqrt(var + 1e-5) * params["ln_weight"] + params["ln_bias"]
    c = jnp.transpose(yn, (0, 2, 1))                                  # (L, E, N), NCH

    def conv1d(xc, w, b, pad):
        out = jax.lax.conv_general_dilated(xc, w, (1,), [(pad, pad)],
                                           dimension_numbers=('NCH', 'OIH', 'NCH'))
        return out + b[None, :, None]

    c = jax.nn.relu(conv1d(c, params["conv0_weight"], params["conv0_bias"], 1))
    c = jax.nn.relu(conv1d(c, params["conv1_weight"], params["conv1_bias"], 1))
    c = conv1d(c, params["conv2_weight"], params["conv2_bias"], 0)
    return jnp.transpose(c, (0, 2, 1)) + src


if __name__ == "__main__":
    # small shapes: seq L=8, batch N=4, d_model E=32, nhead=4, padding=1
    # (padding must be 1 for the module's residual shapes to line up)
    L, N, E, H = 8, 4, 32, 4

    key = jax.random.PRNGKey(0)
    ks = jax.random.split(key, 16)

    params = {
        "in_proj_weight": 0.1 * jax.random.normal(ks[0], (3 * E, E), jnp.float32),
        "in_proj_bias":   0.05 * jax.random.normal(ks[1], (3 * E,), jnp.float32),
        "out_proj_weight": 0.1 * jax.random.normal(ks[2], (E, E), jnp.float32),
        "out_proj_bias":   0.05 * jax.random.normal(ks[3], (E,), jnp.float32),
        "ln_weight": 1.0 + 0.1 * jax.random.normal(ks[4], (E,), jnp.float32),
        "ln_bias":   0.1 * jax.random.normal(ks[5], (E,), jnp.float32),
        "conv0_weight": 0.1 * jax.random.normal(ks[6], (E, E, 1), jnp.float32),
        "conv0_bias":   0.05 * jax.random.normal(ks[7], (E,), jnp.float32),
        "conv1_weight": 0.1 * jax.random.normal(ks[8], (E, E, 5), jnp.float32),
        "conv1_bias":   0.05 * jax.random.normal(ks[9], (E,), jnp.float32),
        "conv2_weight": 0.1 * jax.random.normal(ks[10], (E, E, 1), jnp.float32),
        "conv2_bias":   0.05 * jax.random.normal(ks[11], (E,), jnp.float32),
    }

    src = jax.random.normal(ks[12], (L, N, E), jnp.float32)

    out = bran_encoder_layer(src, params, nhead=H)
    out = jax.block_until_ready(out)

    ref = jax.block_until_ready(ref_forward(src, params, nhead=H))
    # bf16 matmul operands (f32 accumulation) + approx reciprocal -> 2e-2 tol.
    np.testing.assert_allclose(np.asarray(out), np.asarray(ref), rtol=2e-2, atol=2e-2)

    print("KERNEL_OK")
</pallas_src>

<mosaic_0001>
module attributes {stable_mosaic.version = 11 : i64} {
  func.func @kernel(%arg0: memref<32x32xf32, #tpu.memory_space<vmem>>, %arg1: memref<128x384xbf16, #tpu.memory_space<vmem>>, %arg2: memref<1x384xf32, #tpu.memory_space<vmem>>, %arg3: memref<32x128xf32, #tpu.memory_space<vmem>>, %arg4: memref<128x128xbf16, #tpu.memory_space<vmem>>, %arg5: memref<1x128xf32, #tpu.memory_space<vmem>>, %arg6: memref<1x128xf32, #tpu.memory_space<vmem>>, %arg7: memref<1x128xf32, #tpu.memory_space<vmem>>, %arg8: memref<128x128xbf16, #tpu.memory_space<vmem>>, %arg9: memref<1x128xf32, #tpu.memory_space<vmem>>, %arg10: memref<640x128xbf16, #tpu.memory_space<vmem>>, %arg11: memref<4x1x128xf32, #tpu.memory_space<vmem>>, %arg12: memref<128x128xbf16, #tpu.memory_space<vmem>>, %arg13: memref<1x128xf32, #tpu.memory_space<vmem>>, %arg14: memref<32x128xf32, #tpu.memory_space<vmem>>) attributes {dimension_semantics = [], scalar_prefetch = 0 : i64, scratch_operands = 0 : i64, tpu.core_type = #tpu.core_type<tc>} {
    %c0 = arith.constant 0 : index
    %c0_0 = arith.constant 0 : index
    %0 = vector.load %arg0[%c0, %c0_0] : memref<32x32xf32, #tpu.memory_space<vmem>>, vector<32x32xf32>
    %cst = arith.constant 0.000000e+00 : f32
    %1 = vector.broadcast %cst : f32 to vector<32x96xf32>
    %2 = tpu.concatenate %0, %1 in 1 : vector<32x32xf32>, vector<32x96xf32> -> vector<32x128xf32>
    %3 = arith.truncf %2 : vector<32x128xf32> to vector<32x128xbf16>
    %c0_1 = arith.constant 0 : index
    %c0_2 = arith.constant 0 : index
    %4 = vector.load %arg1[%c0_1, %c0_2] : memref<128x384xbf16, #tpu.memory_space<vmem>>, vector<128x384xbf16>
    %cst_3 = arith.constant dense<0.000000e+00> : vector<32x384xf32>
    %5 = tpu.matmul %3, %4, %cst_3 {dimension_numbers = #tpu.dot_dimension_numbers<[1], [0], [0], [1], [0, 0, 1, 1], [], []>} : vector<32x128xbf16>, vector<128x384xbf16>, vector<32x384xf32> -> vector<32x384xf32>
    %c0_4 = arith.constant 0 : index
    %c0_5 = arith.constant 0 : index
    %6 = vector.load %arg2[%c0_4, %c0_5] : memref<1x384xf32, #tpu.memory_space<vmem>>, vector<1x384xf32>
    %7 = vector.broadcast %6 : vector<1x384xf32> to vector<32x384xf32>
    %8 = arith.addf %5, %7 : vector<32x384xf32>
    %9 = vector.extract_strided_slice %8 {offsets = [0, 0], sizes = [32, 128], strides = [1, 1]} : vector<32x384xf32> to vector<32x128xf32>
    %10 = vector.shape_cast %9 : vector<32x128xf32> to vector<4x8x128xf32>
    %11 = vector.extract_strided_slice %8 {offsets = [0, 128], sizes = [32, 128], strides = [1, 1]} : vector<32x384xf32> to vector<32x128xf32>
    %12 = vector.shape_cast %11 : vector<32x128xf32> to vector<4x8x128xf32>
    %13 = vector.extract_strided_slice %8 {offsets = [0, 256], sizes = [32, 128], strides = [1, 1]} : vector<32x384xf32> to vector<32x128xf32>
    %14 = vector.shape_cast %13 : vector<32x128xf32> to vector<4x8x128xf32>
    %c0_6 = arith.constant 0 : index
    %c0_7 = arith.constant 0 : index
    %15 = vector.load %arg3[%c0_6, %c0_7] : memref<32x128xf32, #tpu.memory_space<vmem>>, vector<32x128xf32>
    %16 = tpu.concatenate %10, %10, %10, %10 in 1 : vector<4x8x128xf32>, vector<4x8x128xf32>, vector<4x8x128xf32>, vector<4x8x128xf32> -> vector<4x32x128xf32>
    %17 = vector.shape_cast %15 : vector<32x128xf32> to vector<1x32x128xf32>
    %18 = vector.broadcast %17 : vector<1x32x128xf32> to vector<4x32x128xf32>
    %19 = arith.mulf %16, %18 : vector<4x32x128xf32>
    %20 = arith.truncf %19 : vector<4x32x128xf32> to vector<4x32x128xbf16>
    %21 = arith.truncf %12 : vector<4x8x128xf32> to vector<4x8x128xbf16>
    %22 = arith.truncf %14 : vector<4x8x128xf32> to vector<4x8x128xbf16>
    "tpu.trace_start"() <{level = 10 : i32, message = "nme,nke->nmk"}> : () -> ()
    %cst_8 = arith.constant dense<0.000000e+00> : vector<4x32x8xf32>
    %23 = tpu.matmul %20, %21, %cst_8 {dimension_numbers = #tpu.dot_dimension_numbers<[2], [2], [1], [1], [0, 0, 0, 1, 1, 1], [0], [0]>} : vector<4x32x128xbf16>, vector<4x8x128xbf16>, vector<4x32x8xf32> -> vector<4x32x8xf32>
    "tpu.trace_stop"() : () -> ()
    %cst_9 = arith.constant dense<0xFF800000> : vector<4x32xf32>
    %24 = vector.multi_reduction <maximumf>, %23, %cst_9 [2] : vector<4x32x8xf32> to vector<4x32xf32>
    %25 = vector.shape_cast %24 : vector<4x32xf32> to vector<4x32x1xf32>
    %26 = vector.broadcast %25 : vector<4x32x1xf32> to vector<4x32x8xf32>
    %27 = arith.subf %23, %26 : vector<4x32x8xf32>
    %28 = math.exp %27 : vector<4x32x8xf32>
    %cst_10 = arith.constant dense<0.000000e+00> : vector<4x32xf32>
    %29 = vector.multi_reduction <add>, %28, %cst_10 [2] : vector<4x32x8xf32> to vector<4x32xf32>
    %30 = vector.shape_cast %29 : vector<4x32xf32> to vector<4x32x1xf32>
    %31 = tpu.reciprocal %30 {approx = true} : vector<4x32x1xf32> -> vector<4x32x1xf32>
    %32 = vector.broadcast %31 : vector<4x32x1xf32> to vector<4x32x8xf32>
    %33 = arith.mulf %28, %32 : vector<4x32x8xf32>
    %34 = arith.truncf %33 : vector<4x32x8xf32> to vector<4x32x8xbf16>
    "tpu.trace_start"() <{level = 10 : i32, message = "nmk,nke->nme"}> : () -> ()
    %cst_11 = arith.constant dense<0.000000e+00> : vector<4x32x128xf32>
    %35 = tpu.matmul %34, %22, %cst_11 {dimension_numbers = #tpu.dot_dimension_numbers<[2], [1], [1], [2], [0, 0, 0, 1, 1, 2], [0], [0]>} : vector<4x32x8xbf16>, vector<4x8x128xbf16>, vector<4x32x128xf32> -> vector<4x32x128xf32>
    "tpu.trace_stop"() : () -> ()
    %36 = vector.shape_cast %15 : vector<32x128xf32> to vector<1x32x128xf32>
    %37 = vector.broadcast %36 : vector<1x32x128xf32> to vector<4x32x128xf32>
    %38 = arith.mulf %35, %37 : vector<4x32x128xf32>
    %39 = vector.extract_strided_slice %38 {offsets = [0, 0, 0], sizes = [4, 8, 128], strides = [1, 1, 1]} : vector<4x32x128xf32> to vector<4x8x128xf32>
    %40 = vector.extract_strided_slice %38 {offsets = [0, 8, 0], sizes = [4, 8, 128], strides = [1, 1, 1]} : vector<4x32x128xf32> to vector<4x8x128xf32>
    %41 = arith.addf %39, %40 : vector<4x8x128xf32>
    %42 = vector.extract_strided_slice %38 {offsets = [0, 16, 0], sizes = [4, 8, 128], strides = [1, 1, 1]} : vector<4x32x128xf32> to vector<4x8x128xf32>
    %43 = arith.addf %41, %42 : vector<4x8x128xf32>
    %44 = vector.extract_strided_slice %38 {offsets = [0, 24, 0], sizes = [4, 8, 128], strides = [1, 1, 1]} : vector<4x32x128xf32> to vector<4x8x128xf32>
    %45 = arith.addf %43, %44 : vector<4x8x128xf32>
    %46 = vector.shape_cast %45 : vector<4x8x128xf32> to vector<32x128xf32>
    %47 = arith.truncf %46 : vector<32x128xf32> to vector<32x128xbf16>
    %c0_12 = arith.constant 0 : index
    %c0_13 = arith.constant 0 : index
    %48 = vector.load %arg4[%c0_12, %c0_13] : memref<128x128xbf16, #tpu.memory_space<vmem>>, vector<128x128xbf16>
    %cst_14 = arith.constant dense<0.000000e+00> : vector<32x128xf32>
    %49 = tpu.matmul %47, %48, %cst_14 {dimension_numbers = #tpu.dot_dimension_numbers<[1], [0], [0], [1], [0, 0, 1, 1], [], []>} : vector<32x128xbf16>, vector<128x128xbf16>, vector<32x128xf32> -> vector<32x128xf32>
    %c0_15 = arith.constant 0 : index
    %c0_16 = arith.constant 0 : index
    %50 = vector.load %arg5[%c0_15, %c0_16] : memref<1x128xf32, #tpu.memory_space<vmem>>, vector<1x128xf32>
    %51 = vector.broadcast %50 : vector<1x128xf32> to vector<32x128xf32>
    %52 = arith.addf %49, %51 : vector<32x128xf32>
    %53 = arith.addf %2, %52 : vector<32x128xf32>
    %cst_17 = arith.constant dense<0.000000e+00> : vector<32xf32>
    %54 = vector.multi_reduction <add>, %53, %cst_17 [1] : vector<32x128xf32> to vector<32xf32>
    %55 = vector.shape_cast %54 : vector<32xf32> to vector<32x1xf32>
    %56 = arith.mulf %53, %53 : vector<32x128xf32>
    %cst_18 = arith.constant dense<0.000000e+00> : vector<32xf32>
    %57 = vector.multi_reduction <add>, %56, %cst_18 [1] : vector<32x128xf32> to vector<32xf32>
    %58 = vector.shape_cast %57 : vector<32xf32> to vector<32x1xf32>
    %cst_19 = arith.constant 3.125000e-02 : f32
    %59 = vector.broadcast %cst_19 : f32 to vector<32x1xf32>
    %60 = arith.mulf %55, %59 : vector<32x1xf32>
    %cst_20 = arith.constant 3.125000e-02 : f32
    %61 = vector.broadcast %cst_20 : f32 to vector<32x1xf32>
    %62 = arith.mulf %58, %61 : vector<32x1xf32>
    %63 = arith.mulf %60, %60 : vector<32x1xf32>
    %64 = arith.subf %62, %63 : vector<32x1xf32>
    %65 = vector.broadcast %60 : vector<32x1xf32> to vector<32x128xf32>
    %66 = arith.subf %53, %65 : vector<32x128xf32>
    %cst_21 = arith.constant 9.99999974E-6 : f32
    %67 = vector.broadcast %cst_21 : f32 to vector<32x1xf32>
    %68 = arith.addf %64, %67 : vector<32x1xf32>
    %69 = math.rsqrt %68 : vector<32x1xf32>
    %70 = vector.broadcast %69 : vector<32x1xf32> to vector<32x128xf32>
    %71 = arith.mulf %66, %70 : vector<32x128xf32>
    %c0_22 = arith.constant 0 : index
    %c0_23 = arith.constant 0 : index
    %72 = vector.load %arg6[%c0_22, %c0_23] : memref<1x128xf32, #tpu.memory_space<vmem>>, vector<1x128xf32>
    %73 = vector.broadcast %72 : vector<1x128xf32> to vector<32x128xf32>
    %74 = arith.mulf %71, %73 : vector<32x128xf32>
    %c0_24 = arith.constant 0 : index
    %c0_25 = arith.constant 0 : index
    %75 = vector.load %arg7[%c0_24, %c0_25] : memref<1x128xf32, #tpu.memory_space<vmem>>, vector<1x128xf32>
    %76 = vector.broadcast %75 : vector<1x128xf32> to vector<32x128xf32>
    %77 = arith.addf %74, %76 : vector<32x128xf32>
    %78 = arith.truncf %77 : vector<32x128xf32> to vector<32x128xbf16>
    %c0_26 = arith.constant 0 : index
    %c0_27 = arith.constant 0 : index
    %79 = vector.load %arg8[%c0_26, %c0_27] : memref<128x128xbf16, #tpu.memory_space<vmem>>, vector<128x128xbf16>
    %cst_28 = arith.constant dense<0.000000e+00> : vector<32x128xf32>
    %80 = tpu.matmul %78, %79, %cst_28 {dimension_numbers = #tpu.dot_dimension_numbers<[1], [0], [0], [1], [0, 0, 1, 1], [], []>} : vector<32x128xbf16>, vector<128x128xbf16>, vector<32x128xf32> -> vector<32x128xf32>
    %c0_29 = arith.constant 0 : index
    %c0_30 = arith.constant 0 : index
    %81 = vector.load %arg9[%c0_29, %c0_30] : memref<1x128xf32, #tpu.memory_space<vmem>>, vector<1x128xf32>
    %82 = vector.broadcast %81 : vector<1x128xf32> to vector<32x128xf32>
    %83 = arith.addf %80, %82 : vector<32x128xf32>
    %cst_31 = arith.constant 0.000000e+00 : f32
    %84 = vector.broadcast %cst_31 : f32 to vector<32x128xf32>
    %85 = arith.maximumf %83, %84 : vector<32x128xf32>
    %86 = arith.truncf %85 : vector<32x128xf32> to vector<32x128xbf16>
    %cst_32 = arith.constant 0.000000e+00 : bf16
    %87 = vector.broadcast %cst_32 : bf16 to vector<16x128xbf16>
    %88 = vector.extract_strided_slice %86 {offsets = [0, 0], sizes = [16, 128], strides = [1, 1]} : vector<32x128xbf16> to vector<16x128xbf16>
    %89 = tpu.concatenate %87, %88 in 0 : vector<16x128xbf16>, vector<16x128xbf16> -> vector<32x128xbf16>
    %cst_33 = arith.constant 0.000000e+00 : bf16
    %90 = vector.broadcast %cst_33 : bf16 to vector<8x128xbf16>
    %91 = vector.extract_strided_slice %86 {offsets = [0, 0], sizes = [24, 128], strides = [1, 1]} : vector<32x128xbf16> to vector<24x128xbf16>
    %92 = tpu.concatenate %90, %91 in 0 : vector<8x128xbf16>, vector<24x128xbf16> -> vector<32x128xbf16>
    %93 = vector.extract_strided_slice %86 {offsets = [8, 0], sizes = [24, 128], strides = [1, 1]} : vector<32x128xbf16> to vector<24x128xbf16>
    %cst_34 = arith.constant 0.000000e+00 : bf16
    %94 = vector.broadcast %cst_34 : bf16 to vector<8x128xbf16>
    %95 = tpu.concatenate %93, %94 in 0 : vector<24x128xbf16>, vector<8x128xbf16> -> vector<32x128xbf16>
    %96 = vector.extract_strided_slice %86 {offsets = [16, 0], sizes = [16, 128], strides = [1, 1]} : vector<32x128xbf16> to vector<16x128xbf16>
    %cst_35 = arith.constant 0.000000e+00 : bf16
    %97 = vector.broadcast %cst_35 : bf16 to vector<16x128xbf16>
    %98 = tpu.concatenate %96, %97 in 0 : vector<16x128xbf16>, vector<16x128xbf16> -> vector<32x128xbf16>
    %99 = tpu.concatenate %89, %92, %86, %95, %98 in 1 : vector<32x128xbf16>, vector<32x128xbf16>, vector<32x128xbf16>, vector<32x128xbf16>, vector<32x128xbf16> -> vector<32x640xbf16>
    %c0_36 = arith.constant 0 : index
    %c0_37 = arith.constant 0 : index
    %100 = vector.load %arg10[%c0_36, %c0_37] : memref<640x128xbf16, #tpu.memory_space<vmem>>, vector<640x128xbf16>
    %cst_38 = arith.constant dense<0.000000e+00> : vector<32x128xf32>
    %101 = tpu.matmul %99, %100, %cst_38 {dimension_numbers = #tpu.dot_dimension_numbers<[1], [0], [0], [1], [0, 0, 1, 1], [], []>} : vector<32x640xbf16>, vector<640x128xbf16>, vector<32x128xf32> -> vector<32x128xf32>
    %102 = vector.shape_cast %101 : vector<32x128xf32> to vector<4x8x128xf32>
    %c0_39 = arith.constant 0 : index
    %c0_40 = arith.constant 0 : index
    %c0_41 = arith.constant 0 : index
    %103 = vector.load %arg11[%c0_39, %c0_40, %c0_41] : memref<4x1x128xf32, #tpu.memory_space<vmem>>, vector<4x1x128xf32>
    %104 = vector.broadcast %103 : vector<4x1x128xf32> to vector<4x8x128xf32>
    %105 = arith.addf %102, %104 : vector<4x8x128xf32>
    %cst_42 = arith.constant 0.000000e+00 : f32
    %106 = vector.broadcast %cst_42 : f32 to vector<4x8x128xf32>
    %107 = arith.maximumf %105, %106 : vector<4x8x128xf32>
    %108 = vector.shape_cast %107 : vector<4x8x128xf32> to vector<32x128xf32>
    %109 = arith.truncf %108 : vector<32x128xf32> to vector<32x128xbf16>
    %c0_43 = arith.constant 0 : index
    %c0_44 = arith.constant 0 : index
    %110 = vector.load %arg12[%c0_43, %c0_44] : memref<128x128xbf16, #tpu.memory_space<vmem>>, vector<128x128xbf16>
    %cst_45 = arith.constant dense<0.000000e+00> : vector<32x128xf32>
    %111 = tpu.matmul %109, %110, %cst_45 {dimension_numbers = #tpu.dot_dimension_numbers<[1], [0], [0], [1], [0, 0, 1, 1], [], []>} : vector<32x128xbf16>, vector<128x128xbf16>, vector<32x128xf32> -> vector<32x128xf32>
    %c0_46 = arith.constant 0 : index
    %c0_47 = arith.constant 0 : index
    %112 = vector.load %arg13[%c0_46, %c0_47] : memref<1x128xf32, #tpu.memory_space<vmem>>, vector<1x128xf32>
    %113 = vector.broadcast %112 : vector<1x128xf32> to vector<32x128xf32>
    %114 = arith.addf %111, %113 : vector<32x128xf32>
    %115 = arith.addf %114, %2 : vector<32x128xf32>
    %c0_48 = arith.constant 0 : index
    %c0_49 = arith.constant 0 : index
    %116 = vector.load %arg14[%c0_48, %c0_49] : memref<32x128xf32, #tpu.memory_space<vmem>>, vector<32x128xf32>
    tpu.vector_store %arg14[%c0_48, %c0_49], %115 {strides = array<i32>} : memref<32x128xf32, #tpu.memory_space<vmem>>, vector<32x128xf32>,
    return
  }
}

</mosaic_0001>

<bundles_post_ra>
// kernel: tpu_custom_call.1
= control target key start
LH: loop header
LB: loop body
LE: loop exit
PB: predicated region body
PF: predicated region fallthrough
CT: control target
= control target key end

     0   :  { %19 = vsyncpa [#allocation3], 0  ;;  %s3294_s0 = inlined_call_operand.hbm [shape: f32[32,32], index: 0, kind: input, shape index: {}]   ;;  %s3295_s1 = inlined_call_operand.hbm [shape: bf16[128,384], index: 1, kind: input, shape index: {}]   ;;  %s3296_s2 = inlined_call_operand.vmem [shape: f32[1,384], index: 2, kind: input, shape index: {}]   ;;  %s3297_s3 = inlined_call_operand.hbm [shape: f32[32,128], index: 3, kind: input, shape index: {}]   ;;  %s3298_s4 = inlined_call_operand.hbm [shape: bf16[128,128], index: 4, kind: input, shape index: {}]   ;;  %s3299_s5 = inlined_call_operand.vmem [shape: f32[1,128], index: 5, kind: input, shape index: {}]   ;;  %s3300_s6 = inlined_call_operand.vmem [shape: f32[1,128], index: 6, kind: input, shape index: {}]   ;;  %s3301_s7 = inlined_call_operand.vmem [shape: f32[1,128], index: 7, kind: input, shape index: {}]   ;;  %s3302_s8 = inlined_call_operand.hbm [shape: bf16[128,128], index: 8, kind: input, shape index: {}]   ;;  %s3303_s9 = inlined_call_operand.vmem [shape: f32[1,128], index: 9, kind: input, shape index: {}]   ;;  %s3304_s10 = inlined_call_operand.hbm [shape: bf16[640,128], index: 10, kind: input, shape index: {}]   ;;  %s3305_s11 = inlined_call_operand.vmem [shape: f32[4,1,128], index: 11, kind: input, shape index: {}]   ;;  %s3306_s12 = inlined_call_operand.hbm [shape: bf16[128,128], index: 12, kind: input, shape index: {}]   ;;  %s3307_s13 = inlined_call_operand.vmem [shape: f32[1,128], index: 13, kind: input, shape index: {}]   ;;  %s3308_s14 = inlined_call_operand.hbm [shape: f32[32,128], index: 14, kind: output, shape index: {}]  }
   0x1   :  { %20 = vsyncpa [#allocation6], 0 }
   0x2   :  { %21 = vsyncpa [#allocation9], 0 }
   0x3   :  { %22 = vsyncpa [#allocation12], 0 }
   0x4   :  { %23 = vsyncpa [#allocation4], 0  ;;  %s2866_s29 = smov [#allocation5]  }
   0x5   :  { %s41_s30 = sshll.u32 %s2866_s29, 4  ;;  %s42_s30 = int_to_ptr.vmem [resolvable:$true] %s41_s30 }
   0x6   :  { %s2704_s15 = scalar_lea.vmem %s42_s30, 3072  ;;  %p2709_p1 = scmp.lt.s32.totalorder %s42_s30, %s42_s30 }
   0x7   :  { %p2705_p0 = scmp.ne.s32.totalorder %s42_s30, %s2704_s15  ;;  %p2710_p2 = scmp.lt.s32.totalorder %s2704_s15, %s2704_s15 }
   0x9   :  { %p2711_p3 = por %p2710_p2, %p2709_p1 }
   0xb   :  { %p2712_p4 = pnand %p2711_p3, %p2705_p0 }
   0xd   :  { %2715 = shalt.err (!%p2712_p4)
}
   0xe   :  { %s2867_s16 = smov 192   ;;  %s2868_s17 = smov 12  }
   0xf   :  { %47 = dma.hbm_to_vmem [thread:$0]  %s3295_s1, 3072, %s42_s30, [#allocation6], %s2867_s16, %s2867_s16, %s2868_s17  }
  0x10   :  { %s2869_s20 = smov [#allocation8]  }
  0x11   :  { %s67_s21 = sshll.u32 %s2869_s20, 4  ;;  %s68_s21 = int_to_ptr.vmem [resolvable:$true] %s67_s21 }
  0x12   :  { %s2724_s22 = scalar_lea.vmem %s68_s21, 1024  ;;  %p2729_p6 = scmp.lt.s32.totalorder %s68_s21, %s68_s21 }
  0x13   :  { %p2725_p5 = scmp.ne.s32.totalorder %s68_s21, %s2724_s22  ;;  %p2730_p7 = scmp.lt.s32.totalorder %s2724_s22, %s2724_s22 }
  0x15   :  { %p2731_p8 = por %p2730_p7, %p2729_p6 }
  0x17   :  { %p2732_p9 = pnand %p2731_p8, %p2725_p5 }
  0x19   :  { %2735 = shalt.err (!%p2732_p9)
}
  0x1a   :  { %s2870_s23 = smov 64   ;;  %s2871_s24 = smov 4  }
  0x1b   :  { %73 = dma.hbm_to_vmem [thread:$0]  %s3298_s4, 1024, %s68_s21, [#allocation9], %s2870_s23, %s2870_s23, %s2871_s24  }
  0x1c   :  { %s2872_s1 = smov [#allocation11]   ;;  %s2873_s28 = smov [#allocation2]  }
  0x1d   :  { %s99_s27 = sshll.u32 %s2872_s1, 4  ;;  %s29_s29 = sshll.u32 %s2873_s28, 4  ;;  %s100_s27 = int_to_ptr.vmem [resolvable:$true] %s99_s27  ;;  %s30_s29 = int_to_ptr.vmem [resolvable:$true] %s29_s29 }
  0x1e   :  { %s2744_s30 = scalar_lea.vmem %s100_s27, 5120  ;;  %p2749_p11 = scmp.lt.s32.totalorder %s100_s27, %s100_s27 }
  0x1f   :  { %p2745_p10 = scmp.ne.s32.totalorder %s100_s27, %s2744_s30  ;;  %p2750_p12 = scmp.lt.s32.totalorder %s2744_s30, %s2744_s30 }
  0x21   :  { %p2751_p13 = por %p2750_p12, %p2749_p11 }
  0x23   :  { %p2752_p0 = pnand %p2751_p13, %p2745_p10 }
  0x25   :  { %2755 = shalt.err (!%p2752_p0)
}
  0x26   :  { %105 = dma.hbm_to_vmem [thread:$0]  %s3304_s10, 5120, %s100_s27, [#allocation12], %s2870_s23, %s2870_s23, %s2871_s24  }
  0x27   :  { %s2764_s4 = scalar_lea.vmem %s30_s29, 512  ;;  %p2769_p2 = scmp.lt.s32.totalorder %s30_s29, %s30_s29 }
  0x28   :  { %p2765_p1 = scmp.ne.s32.totalorder %s30_s29, %s2764_s4  ;;  %p2770_p3 = scmp.lt.s32.totalorder %s2764_s4, %s2764_s4 }
  0x2a   :  { %p2771_p4 = por %p2770_p3, %p2769_p2 }
  0x2c   :  { %p2772_p5 = pnand %p2771_p4, %p2765_p1 }
  0x2e   :  { %2775 = shalt.err (!%p2772_p5)
}
  0x2f   :  { %s2874_s17 = smov 128   ;;  %s2875_s18 = smov 8  }
  0x30   :  { %35 = dma.hbm_to_vmem [thread:$0]  %s3294_s0, 512, %s30_s29, [#allocation3], %s2874_s17, %s2874_s17, %s2875_s18  }
  0x31   :  { %s2876_s21 = smov [#allocation7]   ;;  %s2877_s25 = smov [#allocation10]  }
  0x32   :  { %s55_s22 = sshll.u32 %s2876_s21, 4  ;;  %s85_s10 = sshll.u32 %s2877_s25, 4  ;;  %s56_s22 = int_to_ptr.vmem [resolvable:$true] %s55_s22  ;;  %s86_s10 = int_to_ptr.vmem [resolvable:$true] %s85_s10 }
  0x33   :  { %s2784_s26 = scalar_lea.vmem %s56_s22, 512  ;;  %p2789_p7 = scmp.lt.s32.totalorder %s56_s22, %s56_s22 }
  0x34   :  { %p2785_p6 = scmp.ne.s32.totalorder %s56_s22, %s2784_s26  ;;  %p2790_p8 = scmp.lt.s32.totalorder %s2784_s26, %s2784_s26 }
  0x36   :  { %p2791_p9 = por %p2790_p8, %p2789_p7 }
  0x38   :  { %p2792_p10 = pnand %p2791_p9, %p2785_p6 }
  0x3a   :  { %2795 = shalt.err (!%p2792_p10)
}
  0x3b   :  { %61 = dma.hbm_to_vmem [thread:$0]  %s3297_s3, 512, %s56_s22, [#allocation6], %s2874_s17, %s2874_s17, %s2875_s18  }
  0x3c   :  { %s2804_s0 = scalar_lea.vmem %s86_s10, 1024  ;;  %p2809_p12 = scmp.lt.s32.totalorder %s86_s10, %s86_s10 }
  0x3d   :  { %p2805_p11 = scmp.ne.s32.totalorder %s86_s10, %s2804_s0  ;;  %p2810_p13 = scmp.lt.s32.totalorder %s2804_s0, %s2804_s0 }
  0x3f   :  { %p2811_p0 = por %p2810_p13, %p2809_p12 }
  0x41   :  { %p2812_p1 = pnand %p2811_p0, %p2805_p11 }
  0x43   :  { %2815 = shalt.err (!%p2812_p1)
}
  0x44   :  { %91 = dma.hbm_to_vmem [thread:$0]  %s3302_s8, 1024, %s86_s10, [#allocation9], %s2870_s23, %s2870_s23, %s2871_s24  }
  0x45   :  { %s2878_s30 = smov [#allocation13]  }
  0x46   :  { %s113_s15 = sshll.u32 %s2878_s30, 4  ;;  %s114_s15 = int_to_ptr.vmem [resolvable:$true] %s113_s15 }
  0x47   :  { %s2824_s16 = scalar_lea.vmem %s114_s15, 1024  ;;  %p2829_p3 = scmp.lt.s32.totalorder %s114_s15, %s114_s15 }
  0x48   :  { %p2825_p2 = scmp.ne.s32.totalorder %s114_s15, %s2824_s16  ;;  %p2830_p4 = scmp.lt.s32.totalorder %s2824_s16, %s2824_s16 }
  0x4a   :  { %p2831_p5 = por %p2830_p4, %p2829_p3 }
  0x4c   :  { %p2832_p6 = pnand %p2831_p5, %p2825_p2 }
  0x4e   :  { %2835 = shalt.err (!%p2832_p6)
}
  0x4f   :  { %119 = dma.hbm_to_vmem [thread:$0]  %s3306_s12, 1024, %s114_s15, [#allocation12], %s2870_s23, %s2870_s23, %s2871_s24  }
  0x50   :  { %2856 = dma.done.wait [#allocation3], 512  }
  0x51   :  { %2857 = vsyncadd [#allocation3], 4294966784 }
  0x52   :  { %2858 = dma.done.wait [#allocation6], 3584  }
  0x53   :  { %2859 = vsyncadd [#allocation6], 4294963712 }
  0x54   :  { %2860 = dma.done.wait [#allocation9], 2048  }
  0x55   :  { %2861 = vsyncadd [#allocation9], 4294965248 }
  0x56   :  { %2862 = dma.done.wait [#allocation12], 6144  }
  0x57   :  { %2863 = vsyncadd [#allocation12], 4294961152  ;;  %v2879_v0 = vmov 0   ;;  %v2524_v1 = vld [vmem:[#allocation5 + $0xac] ss:$12 sps:$4 sm:$0xff]   ;;  %vm148_vm0 = vcmask 261120   ;;  %v189_v32 = vlaneseq }
  0x58   :  { %364 = vmatprep.mubr.bf16.mxu0 %v2879_v0  ;;  %v2526_v2 = vld [vmem:[#allocation5 + $0xa8] ss:$12 sps:$4 sm:$0xff]   ;;  %332 = vmatprep.subr.bf16.mxu0 %v2524_v1  ;;  %v2529_v4 = vld [vmem:[#allocation5 + $0x90] ss:$12 sps:$4 sm:$0xff]   ;;  %v2532_v6 = vld [vmem:[#allocation5 + $0x78] ss:$12 sps:$4 sm:$0xff]  }
  0x59   :  { %v2527_v3 = vld [vmem:[#allocation5 + $0x94] ss:$12 sps:$4 sm:$0xff]   ;;  %333 = vmatpush1.bf16.msra.mxu0 %v2526_v2  ;;  %v2530_v5 = vld [vmem:[#allocation5 + $0x7c] ss:$12 sps:$4 sm:$0xff]   ;;  %v2533_v7 = vld [vmem:[#allocation5 + $0x64] ss:$12 sps:$4 sm:$0xff]  }
  0x5a   :  { %334 = vmatprep.subr.bf16.mxu0 %v2527_v3  ;;  %v144_v8 = vld [vmem:[#allocation2] sm:$0xff]  ;;  %vm2998_vm1 = vmpackc.low %vm148_vm0, %vm148_vm0  ;;  %v2536_v11 = vld [vmem:[#allocation5 + $0x4c] ss:$12 sps:$4 sm:$0xff]   ;;  %v190_v33 = vshrl.u32 %v189_v32, 7  ;;  %vm857_vm2 = vcmask 1043456   ;;  %vm666_vm3 = vcmask 64512  }
  0x5b   :  { %v2535_v10 = vld [vmem:[#allocation5 + $0x60] ss:$12 sps:$4 sm:$0xff]   ;;  %v2548_v14 = vld [vmem:[#allocation5 + $0xb0] ss:$12 sps:$4 sm:$0xff]   ;;  %v2549_v15 = vld [vmem:[#allocation5 + $0x98] ss:$12 sps:$4 sm:$0xff]  }
  0x5c   :  { %v145_v12 = vld [vmem:[#allocation2 + $0x8] sm:$0xff]  ;;  %2357 = vmatprep.subr.bf16.mxu1 %v2548_v14  ;;  %v2539_v17 = vld [vmem:[#allocation5 + $0x34] ss:$12 sps:$4 sm:$0xff]   ;;  %v2541_v19 = vld [vmem:[#allocation5 + $0x30] ss:$12 sps:$4 sm:$0xff]   ;;  %v199_v34 = vsub.s32 2, %v190_v33 }
  0x5d   :  { %335 = vmatpush1.bf16.msra.mxu0 %v2529_v4  ;;  %v2132_v13 = vpack.c.bf16 %v145_v12, %v144_v8  ;;  %v2538_v16 = vld [vmem:[#allocation5 + $0x48] ss:$12 sps:$4 sm:$0xff]   ;;  %2358 = vmatpush3.bf16.msra.mxu1 %v2548_v14  ;;  %v2550_v18 = vld [vmem:[#allocation5 + $0x80] ss:$12 sps:$4 sm:$0xff]   ;;  %v2544_v22 = vld [vmem:[#allocation5 + $0x18] ss:$12 sps:$4 sm:$0xff]  }
  0x5e   :  { %336 = vmatprep.subr.bf16.mxu0 %v2530_v5  ;;  %2359 = vmatprep.subr.bf16.mxu1 %v2549_v15  ;;  %v2542_v20 = vld [vmem:[#allocation5 + $0x1c] ss:$12 sps:$4 sm:$0xff]   ;;  %v2545_v23 = vld [vmem:[#allocation5 + $0x4] ss:$12 sps:$4 sm:$0xff]   ;;  %v2547_v25 = vld [vmem:[#allocation5] ss:$12 sps:$4 sm:$0xff]  }
  0x5f   :  { %2373 = vmatprep.mubr.msk.bf16.mxu1 %vm2998_vm1, %v2132_v13  ;;  %v2551_v21 = vld [vmem:[#allocation5 + $0x68] ss:$12 sps:$4 sm:$0xff]   ;;  %v2552_v24 = vld [vmem:[#allocation5 + $0x50] ss:$12 sps:$4 sm:$0xff]   ;;  %v2553_v26 = vld [vmem:[#allocation5 + $0x38] ss:$12 sps:$4 sm:$0xff]  }
  0x60   :  { %v2554_v27 = vld [vmem:[#allocation5 + $0x20] ss:$12 sps:$4 sm:$0xff]   ;;  %v146_v28 = vld [vmem:[#allocation2 + $0x10] sm:$0xff]  ;;  %v147_v29 = vld [vmem:[#allocation2 + $0x18] sm:$0xff]  ;;  %v191_v37 = vsub.s32 0, %v190_v33  ;;  %v195_v38 = vsub.s32 1, %v190_v33 }
  0x61   :  { %337 = vmatpush1.bf16.msra.mxu0 %v2532_v6  ;;  %2360 = vmatpush3.bf16.msra.mxu1 %v2549_v15  ;;  %v2135_v30 = vpack.c.bf16 %v147_v29, %v146_v28  ;;  %v2555_v31 = vld [vmem:[#allocation5 + $0x8] ss:$12 sps:$4 sm:$0xff]   ;;  %v187_v35 = vld [vmem:[%s3296_s2] sm:$0x7]  ;;  %v3024_v51 = vld [vmem:[#allocation7 + $0x18] sm:$0xff] }
  0x62   :  { %338 = vmatprep.subr.bf16.mxu0 %v2533_v7  ;;  %2361 = vmatprep.subr.bf16.mxu1 %v2550_v18  ;;  %v3014_v36 = vrot.slane %v187_v35, %v199_v34  ;;  %v192_v39 = vrot.slane %v187_v35, %v191_v37  ;;  %v196_v40 = vrot.slane %v187_v35, %v195_v38  ;;  %v3016_v42 = vld [vmem:[#allocation7] sm:$0xff]  ;;  %v3018_v44 = vld [vmem:[#allocation7 + $0x8] sm:$0xff]  ;;  %v3022_v50 = vld [vmem:[#allocation7 + $0x10] sm:$0xff] }
  0x63   :  { %vm2211_vm4 = vmneg %vm857_vm2 }
  0x65   :  { %339 = vmatpush1.bf16.msra.mxu0 %v2535_v10  ;;  %2362 = vmatpush3.bf16.msra.mxu1 %v2550_v18 }
  0x66   :  { %340 = vmatprep.subr.bf16.mxu0 %v2536_v11  ;;  %2363 = vmatprep.subr.bf16.mxu1 %v2551_v21 }
  0x69   :  { %341 = vmatpush1.bf16.msra.mxu0 %v2538_v16  ;;  %2364 = vmatpush3.bf16.msra.mxu1 %v2551_v21 }
  0x6a   :  { %342 = vmatprep.subr.bf16.mxu0 %v2539_v17  ;;  %2365 = vmatprep.subr.bf16.mxu1 %v2552_v24 }
  0x6d   :  { %343 = vmatpush1.bf16.msra.mxu0 %v2541_v19  ;;  %2366 = vmatpush3.bf16.msra.mxu1 %v2552_v24 }
  0x6e   :  { %344 = vmatprep.subr.bf16.mxu0 %v2542_v20  ;;  %2367 = vmatprep.subr.bf16.mxu1 %v2553_v26 }
  0x71   :  { %345 = vmatpush1.bf16.msra.mxu0 %v2544_v22  ;;  %2368 = vmatpush3.bf16.msra.mxu1 %v2553_v26 }
  0x72   :  { %346 = vmatprep.subr.bf16.mxu0 %v2545_v23  ;;  %2369 = vmatprep.subr.bf16.mxu1 %v2554_v27 }
  0x75   :  { %347 = vmatpush1.bf16.msra.mxu0 %v2547_v25  ;;  %2370 = vmatpush3.bf16.msra.mxu1 %v2554_v27 }
  0x76   :  { %2371 = vmatprep.subr.bf16.mxu1 %v2555_v31 }
  0x78   :  { %2133 = vmatmul.mubr.msk.bf16.vlgmr.msra.gmra.mxu0 %vm2998_vm1, %v2132_v13 }
  0x79   :  { %374 = vmatprep.mubr.bf16.mxu0 %v2879_v0  ;;  %2372 = vmatpush3.bf16.msra.mxu1 %v2555_v31 }
  0x7c   :  { %2374 = vmatmul.mubr.msk.bf16.vlgmr.msra.gmra.mxu1 %vm2998_vm1, %v2135_v30 }
  0x80   :  { %2136 = vmatmul.mubr.msk.bf16.gmra.mxu0 %vm2998_vm1, %v2135_v30 }
 0x138   :  { %v366_v41 = vpop.f32.mrf.mxu0 }
 0x139   :  { %v367_v43 = vadd.f32 %v366_v41, %v192_v39 }
 0x13a   :  { %v368_v45 = vpop.f32.mrf.mxu0 }
 0x13b   :  { %v369_v46 = vadd.f32 %v368_v45, %v196_v40  ;;  %v438_v47 = vmul.f32 %v3016_v42, %v367_v43  ;;  %v439_v49 = vmul.f32 %v3018_v44, %v367_v43  ;;  %v440_v58 = vmul.f32 %v3022_v50, %v367_v43 }
 0x13c   :  { %v370_v48 = vpop.f32.mrf.mxu0  ;;  %v441_v59 = vmul.f32 %v3024_v51, %v367_v43  ;;  %v2375_v26 = vpop.f32.mrf.mxu1 }
 0x13d   :  { %v462_v52 = vpack.c.bf16 %v369_v46, %v369_v46  ;;  %v371_v53 = vadd.f32 %v370_v48, %v192_v39  ;;  %v454_v55 = vpack.c.bf16 %v439_v49, %v438_v47  ;;  %v428_v27 = vadd.f32 %v2375_v26, %v3014_v36 }
 0x13e   :  { %v372_v54 = vpop.f32.mrf.mxu0  ;;  %v455_v6 = vpack.c.bf16 %v441_v59, %v440_v58  ;;  %v419_v28 = vpop.f32.mrf.mxu1 }
 0x13f   :  { %v373_v56 = vadd.f32 %v372_v54, %v196_v40  ;;  %2377 = vmatprep.subr.bf16.mxu1 %v462_v52  ;;  %v442_v57 = vmul.f32 %v3016_v42, %v371_v53  ;;  %2379 = vmatprep.mubr.bf16.mxu1 %v454_v55  ;;  %v443_v61 = vmul.f32 %v3018_v44, %v371_v53 }
 0x140   :  { %v376_v60 = vpop.f32.mrf.mxu0  ;;  %2378 = vmatpush3.bf16.xpose.msra.mxu1 %v462_v52  ;;  %v444_v8 = vmul.f32 %v3022_v50, %v371_v53  ;;  %v445_v9 = vmul.f32 %v3024_v51, %v371_v53  ;;  %v420_v29 = vadd.f32 %v419_v28, %v3014_v36  ;;  %v2376_v30 = vpop.f32.mrf.mxu1  ;;  %v3042_v31 = vpack.c.bf16 %v428_v27, %v428_v27 }
 0x141   :  { %v463_v62 = vpack.c.bf16 %v373_v56, %v373_v56  ;;  %v377_v63 = vadd.f32 %v376_v60, %v192_v39  ;;  %v456_v2 = vpack.c.bf16 %v443_v61, %v442_v57  ;;  %v431_v33 = vadd.f32 %v2376_v30, %v3014_v36 }
 0x142   :  { %v378_v1 = vpop.f32.mrf.mxu0  ;;  %v457_v19 = vpack.c.bf16 %v445_v9, %v444_v8  ;;  %v466_v32 = vpack.c.bf16 %v420_v29, %v420_v29  ;;  %v422_v34 = vpop.f32.mrf.mxu1 }
 0x143   :  { %v379_v3 = vadd.f32 %v378_v1, %v196_v40  ;;  %2383 = vmatprep.subr.bf16.mxu0 %v463_v62  ;;  %v446_v4 = vmul.f32 %v3016_v42, %v377_v63  ;;  %2385 = vmatprep.mubr.bf16.mxu0 %v456_v2  ;;  %v447_v7 = vmul.f32 %v3018_v44, %v377_v63 }
 0x144   :  { %v380_v5 = vpop.f32.mrf.mxu0  ;;  %2384 = vmatpush3.bf16.xpose.msra.mxu0 %v463_v62  ;;  %v448_v14 = vmul.f32 %v3022_v50, %v377_v63  ;;  %v449_v15 = vmul.f32 %v3024_v51, %v377_v63  ;;  %v859_v35 = vsel %vm857_vm2, %v466_v32, 0  ;;  %v423_v37 = vadd.f32 %v422_v34, %v3014_v36 }
 0x145   :  { %v464_v10 = vpack.c.bf16 %v379_v3, %v379_v3  ;;  %v381_v11 = vadd.f32 %v380_v5, %v192_v39  ;;  %v458_v13 = vpack.c.bf16 %v447_v7, %v446_v4  ;;  %v3048_v38 = vpack.c.bf16 %v431_v33, %v431_v33 }
 0x146   :  { %v382_v12 = vpop.f32.mrf.mxu0  ;;  %v459_v24 = vpack.c.bf16 %v449_v15, %v448_v14  ;;  %v467_v39 = vpack.c.bf16 %v423_v37, %v423_v37 }
 0x147   :  { %v383_v16 = vadd.f32 %v382_v12, %v196_v40  ;;  %2380 = vmatmul.mubr.bf16.vlgmr.msra.gmra.mxu1 %v455_v6  ;;  %2389 = vmatprep.subr.bf16.mxu1 %v464_v10  ;;  %v450_v17 = vmul.f32 %v3016_v42, %v381_v11  ;;  %v451_v18 = vmul.f32 %v3018_v44, %v381_v11 }
 0x148   :  { %2390 = vmatpush3.bf16.xpose.msra.mxu1 %v464_v10  ;;  %2391 = vmatprep.mubr.bf16.mxu1 %v458_v13  ;;  %v452_v22 = vmul.f32 %v3022_v50, %v381_v11  ;;  %v453_v23 = vmul.f32 %v3024_v51, %v381_v11  ;;  %v917_v40 = vsel %vm857_vm2, %v467_v39, 0 }
 0x149   :  { %v465_v20 = vpack.c.bf16 %v383_v16, %v383_v16  ;;  %v460_v21 = vpack.c.bf16 %v451_v18, %v450_v17  ;;  %2505 = vmatprep.subr.msk.bf16.mxu1 %vm857_vm2, %v466_v32 }
 0x14a   :  { %v461_v25 = vpack.c.bf16 %v453_v23, %v452_v22 }
 0x14b   :  { %2386 = vmatmul.mubr.bf16.vlgmr.msra.gmra.mxu0 %v457_v19  ;;  %2395 = vmatprep.subr.bf16.mxu0 %v465_v20 }
 0x14c   :  { %2396 = vmatpush3.bf16.xpose.msra.mxu0 %v465_v20  ;;  %2397 = vmatprep.mubr.bf16.mxu0 %v460_v21 }
 0x14d   :  { %2506 = vmatprep.subr.msk.bf16.mxu0 %vm857_vm2, %v467_v39 }
 0x14f   :  { %2392 = vmatmul.mubr.bf16.vlgmr.msra.gmra.mxu1 %v459_v24 }
 0x150   :  { %2402 = vmatpush3.bf16.msra.mxu1 %v859_v35 }
 0x151   :  { %2507 = vmatprep.subr.msk.bf16.mxu1 %vm857_vm2, %v3042_v31 }
 0x153   :  { %2398 = vmatmul.mubr.bf16.vlgmr.msra.gmra.mxu0 %v461_v25 }
 0x154   :  { %2408 = vmatpush3.bf16.msra.mxu0 %v917_v40 }
 0x155   :  { %2508 = vmatprep.subr.msk.bf16.mxu0 %vm857_vm2, %v3048_v38 }
 0x207   :  { %v2381_v41 = vpop.f32.mrf.mxu1 }
 0x208   :  { %v673_v36 = vsel %vm666_vm3, %v2381_v41, -inf }
 0x209   :  { %674 = vmax.xlane.f32.xlu0 %v673_v36  ;;  %v504_v43 = vpop.f32.mrf.mxu1 }
 0x20a   :  { %v667_v47 = vsel %vm666_vm3, %v504_v43, -inf }
 0x20b   :  { %v2382_v45 = vpop.f32.mrf.mxu1  ;;  %v2387_v46 = vpop.f32.mrf.mxu0 }
 0x20c   :  { %v676_v48 = vsel %vm666_vm3, %v2382_v45, -inf  ;;  %v685_v54 = vsel %vm666_vm3, %v2387_v46, -inf }
 0x20d   :  { %v553_v49 = vpop.f32.mrf.mxu0  ;;  %668 = vmax.xlane.f32.xlu0 %v667_v47  ;;  %677 = vmax.xlane.f32.xlu1 %v676_v48  ;;  %v507_v52 = vpop.f32.mrf.mxu1 }
 0x20e   :  { %v679_v55 = vsel %vm666_vm3, %v553_v49, -inf  ;;  %v670_v59 = vsel %vm666_vm3, %v507_v52, -inf }
 0x20f   :  { %v2388_v53 = vpop.f32.mrf.mxu0  ;;  %v2393_v57 = vpop.f32.mrf.mxu1 }
 0x210   :  { %v688_v58 = vsel %vm666_vm3, %v2388_v53, -inf  ;;  %v697_v63 = vsel %vm666_vm3, %v2393_v57, -inf }
 0x211   :  { %v3061_v56 = vpop.f32.mrf.mxu0  ;;  %686 = vmax.xlane.f32.xlu0 %v685_v54  ;;  %680 = vmax.xlane.f32.xlu1 %v679_v55  ;;  %v3065_v60 = vpop.f32.mrf.mxu1 }
 0x212   :  { %v682_v62 = vsel %vm666_vm3, %v3061_v56, -inf  ;;  %v691_v3 = vsel %vm666_vm3, %v3065_v60, -inf }
 0x213   :  { %v3067_v61 = vpop.f32.mrf.mxu0  ;;  %v3074_v2 = vpop.f32.mrf.mxu1 }
 0x214   :  { %v700_v4 = vsel %vm666_vm3, %v3074_v2, -inf  ;;  %v709_v10 = vsel %vm666_vm3, %v3067_v61, -inf }
 0x215   :  { %689 = vmax.xlane.f32.xlu1 %v688_v58  ;;  %671 = vmax.xlane.f32.xlu0 %v670_v59  ;;  %v3072_v1 = vpop.f32.mrf.mxu0  ;;  %v3080_v5 = vpop.f32.mrf.mxu1 }
 0x216   :  { %v703_v7 = vsel %vm666_vm3, %v3072_v1, -inf  ;;  %v694_v8 = vsel %vm666_vm3, %v3080_v5, -inf }
 0x217   :  { %v3082_v6 = vpop.f32.mrf.mxu0 }
 0x218   :  { %v712_v12 = vsel %vm666_vm3, %v3082_v6, -inf }
 0x219   :  { %683 = vmax.xlane.f32.xlu1 %v682_v62  ;;  %698 = vmax.xlane.f32.xlu0 %v697_v63  ;;  %v3088_v9 = vpop.f32.mrf.mxu0 }
 0x21a   :  { %v706_v11 = vsel %vm666_vm3, %v3088_v9, -inf }
 0x21d   :  { %692 = vmax.xlane.f32.xlu0 %v691_v3  ;;  %701 = vmax.xlane.f32.xlu1 %v700_v4 }
 0x221   :  { %704 = vmax.xlane.f32.xlu0 %v703_v7  ;;  %695 = vmax.xlane.f32.xlu1 %v694_v8 }
 0x225   :  { %710 = vmax.xlane.f32.xlu0 %v709_v10  ;;  %707 = vmax.xlane.f32.xlu1 %v706_v11 }
 0x229   :  { %713 = vmax.xlane.f32.xlu1 %v712_v12 }
 0x292   :  { %v675_v13 = vpop.xlane.xlu0 %674 }
 0x293   :  { %v717_v14 = vsub.f32 %v2381_v41, %v675_v13 }
 0x295   :  { %v735_v15 = vmul.f32 1.442695, %v717_v14 }
 0x296   :  { %v669_v16 = vpop.xlane.xlu0 %668  ;;  %v678_v17 = vpop.xlane.xlu1 %677 }
 0x297   :  { %2620 = vpow2.f32 %v735_v15  ;;  %v715_v18 = vsub.f32 %v504_v43, %v669_v16  ;;  %v718_v19 = vsub.f32 %v2382_v45, %v678_v17 }
 0x299   :  { %v731_v20 = vmul.f32 1.442695, %v715_v18  ;;  %v737_v21 = vmul.f32 1.442695, %v718_v19 }
 0x29a   :  { %v687_v22 = vpop.xlane.xlu0 %686  ;;  %v681_v23 = vpop.xlane.xlu1 %680 }
 0x29b   :  { %2622 = vpow2.f32 %v731_v20  ;;  %v721_v24 = vsub.f32 %v2387_v46, %v687_v22  ;;  %v719_v25 = vsub.f32 %v553_v49, %v681_v23 }
 0x29c   :  { %2624 = vpow2.f32 %v737_v21 }
 0x29d   :  { %v743_v26 = vmul.f32 1.442695, %v721_v24  ;;  %v739_v27 = vmul.f32 1.442695, %v719_v25 }
 0x29e   :  { %v690_v28 = vpop.xlane.xlu1 %689  ;;  %v672_v29 = vpop.xlane.xlu0 %671 }
 0x29f   :  { %2626 = vpow2.f32 %v743_v26  ;;  %v722_v30 = vsub.f32 %v2388_v53, %v690_v28  ;;  %v716_v32 = vsub.f32 %v507_v52, %v672_v29 }
 0x2a0   :  { %2628 = vpow2.f32 %v739_v27 }
 0x2a1   :  { %v733_v33 = vmul.f32 1.442695, %v716_v32  ;;  %v745_v34 = vmul.f32 1.442695, %v722_v30 }
 0x2a2   :  { %v684_v35 = vpop.xlane.xlu1 %683  ;;  %v699_v37 = vpop.xlane.xlu0 %698 }
 0x2a3   :  { %v720_v39 = vsub.f32 %v3061_v56, %v684_v35  ;;  %v725_v40 = vsub.f32 %v2393_v57, %v699_v37  ;;  %2630 = vpow2.f32 %v733_v33 }
 0x2a4   :  { %v3097_v41 = vpop.eup %2620  ;;  %2632 = vpow2.f32 %v745_v34 }
 0x2a5   :  { %v751_v36 = vmul.f32 1.442695, %v725_v40  ;;  %v769_v43 = vsel %vm666_vm3, %v3097_v41, 0.0  ;;  %v741_v45 = vmul.f32 1.442695, %v720_v39 }
 0x2a6   :  { %770 = vadd.xlane.f32.xlu0 %v769_v43  ;;  %v693_v46 = vpop.xlane.xlu0 %692  ;;  %v702_v47 = vpop.xlane.xlu1 %701 }
 0x2a7   :  { %v723_v48 = vsub.f32 %v3065_v60, %v693_v46  ;;  %v726_v49 = vsub.f32 %v3074_v2, %v702_v47  ;;  %2634 = vpow2.f32 %v751_v36 }
 0x2a8   :  { %v3103_v52 = vpop.eup %2622  ;;  %2636 = vpow2.f32 %v741_v45 }
 0x2a9   :  { %v3105_v53 = vpop.eup %2624  ;;  %v747_v54 = vmul.f32 1.442695, %v723_v48  ;;  %v763_v55 = vsel %vm666_vm3, %v3103_v52, 0.0  ;;  %v753_v56 = vmul.f32 1.442695, %v726_v49 }
 0x2aa   :  { %764 = vadd.xlane.f32.xlu0 %v763_v55  ;;  %v705_v57 = vpop.xlane.xlu0 %704  ;;  %v772_v58 = vsel %vm666_vm3, %v3105_v53, 0.0  ;;  %v696_v59 = vpop.xlane.xlu1 %695 }
 0x2ab   :  { %2638 = vpow2.f32 %v747_v54  ;;  %v727_v60 = vsub.f32 %v3072_v1, %v705_v57  ;;  %773 = vadd.xlane.f32.xlu1 %v772_v58  ;;  %v724_v62 = vsub.f32 %v3080_v5, %v696_v59 }
 0x2ac   :  { %v3113_v63 = vpop.eup %2626  ;;  %2640 = vpow2.f32 %v753_v56 }
 0x2ad   :  { %v755_v2 = vmul.f32 1.442695, %v727_v60  ;;  %v781_v3 = vsel %vm666_vm3, %v3113_v63, 0.0  ;;  %v3117_v4 = vpop.eup %2628  ;;  %v749_v7 = vmul.f32 1.442695, %v724_v62 }
 0x2ae   :  { %782 = vadd.xlane.f32.xlu0 %v781_v3  ;;  %v711_v8 = vpop.xlane.xlu0 %710  ;;  %v708_v10 = vpop.xlane.xlu1 %707  ;;  %v775_v13 = vsel %vm666_vm3, %v3117_v4, 0.0 }
 0x2af   :  { %2642 = vpow2.f32 %v755_v2  ;;  %v729_v11 = vsub.f32 %v3067_v61, %v711_v8  ;;  %v728_v1 = vsub.f32 %v3088_v9, %v708_v10 }
 0x2b0   :  { %v3121_v12 = vpop.eup %2630  ;;  %2644 = vpow2.f32 %v749_v7 }
 0x2b1   :  { %v759_v5 = vmul.f32 1.442695, %v729_v11  ;;  %v757_v14 = vmul.f32 1.442695, %v728_v1  ;;  %v766_v15 = vsel %vm666_vm3, %v3121_v12, 0.0  ;;  %v3127_v17 = vpop.eup %2632 }
 0x2b2   :  { %776 = vadd.xlane.f32.xlu0 %v775_v13  ;;  %v714_v16 = vpop.xlane.xlu1 %713  ;;  %767 = vadd.xlane.f32.xlu1 %v766_v15  ;;  %v784_v20 = vsel %vm666_vm3, %v3127_v17, 0.0 }
 0x2b3   :  { %2646 = vpow2.f32 %v759_v5  ;;  %v730_v61 = vsub.f32 %v3082_v6, %v714_v16 }
 0x2b4   :  { %v3130_v9 = vpop.eup %2634  ;;  %2648 = vpow2.f32 %v757_v14 }
 0x2b5   :  { %v761_v18 = vmul.f32 1.442695, %v730_v61  ;;  %v793_v19 = vsel %vm666_vm3, %v3130_v9, 0.0  ;;  %v3136_v21 = vpop.eup %2636 }
 0x2b6   :  { %794 = vadd.xlane.f32.xlu0 %v793_v19  ;;  %785 = vadd.xlane.f32.xlu1 %v784_v20  ;;  %v778_v6 = vsel %vm666_vm3, %v3136_v21, 0.0 }
 0x2b7   :  { %2650 = vpow2.f32 %v761_v18 }
 0x2b8   :  { %v3138_v22 = vpop.eup %2638 }
 0x2b9   :  { %v787_v23 = vsel %vm666_vm3, %v3138_v22, 0.0  ;;  %v3144_v24 = vpop.eup %2640 }
 0x2ba   :  { %788 = vadd.xlane.f32.xlu0 %v787_v23  ;;  %779 = vadd.xlane.f32.xlu1 %v778_v6  ;;  %v796_v27 = vsel %vm666_vm3, %v3144_v24, 0.0  ;;  %v1033_v6 = vsel %vm857_vm2, %v3048_v38, 0 }
 0x2bc   :  { %v3146_v25 = vpop.eup %2642 }
 0x2bd   :  { %v799_v26 = vsel %vm666_vm3, %v3146_v25, 0.0  ;;  %v3152_v28 = vpop.eup %2644 }
 0x2be   :  { %800 = vadd.xlane.f32.xlu0 %v799_v26  ;;  %797 = vadd.xlane.f32.xlu1 %v796_v27  ;;  %v790_v32 = vsel %vm666_vm3, %v3152_v28, 0.0 }
 0x2c0   :  { %v3154_v29 = vpop.eup %2646 }
 0x2c1   :  { %v805_v30 = vsel %vm666_vm3, %v3154_v29, 0.0  ;;  %v3160_v33 = vpop.eup %2648 }
 0x2c2   :  { %806 = vadd.xlane.f32.xlu0 %v805_v30  ;;  %791 = vadd.xlane.f32.xlu1 %v790_v32  ;;  %v802_v34 = vsel %vm666_vm3, %v3160_v33, 0.0 }
 0x2c4   :  { %v3164_v35 = vpop.eup %2650 }
 0x2c5   :  { %v808_v37 = vsel %vm666_vm3, %v3164_v35, 0.0 }
 0x2c6   :  { %803 = vadd.xlane.f32.xlu1 %v802_v34 }
 0x2ca   :  { %809 = vadd.xlane.f32.xlu1 %v808_v37 }
 0x32f   :  { %v771_v39 = vpop.xlane.xlu0 %770 }
 0x333   :  { %v765_v40 = vpop.xlane.xlu0 %764 }
 0x334   :  { %v774_v36 = vpop.xlane.xlu1 %773 }
 0x335   :  { %2652 = vrcp.f32 %v774_v36 }
 0x336   :  { %2654 = vrcp.f32 %v765_v40 }
 0x337   :  { %v783_v43 = vpop.xlane.xlu0 %782  ;;  %2656 = vrcp.f32 %v771_v39 }
 0x33b   :  { %v777_v45 = vpop.xlane.xlu0 %776  ;;  %v768_v46 = vpop.xlane.xlu1 %767 }
 0x33c   :  { %2658 = vrcp.f32 %v768_v46  ;;  %v2560_v46 = vld [vmem:[#allocation8 + $0x18] sm:$0xff]  }
 0x33f   :  { %v795_v47 = vpop.xlane.xlu0 %794  ;;  %v786_v48 = vpop.xlane.xlu1 %785 }
 0x340   :  { %2660 = vrcp.f32 %v786_v48 }
 0x341   :  { %2662 = vrcp.f32 %v777_v45  ;;  %v2559_v45 = vld [vmem:[#allocation8 + $0x20] sm:$0xff]  }
 0x342   :  { %2664 = vrcp.f32 %v783_v43  ;;  %v2653_v55 = vpop.eup %2652  ;;  %v2556_v43 = vld [vmem:[#allocation8 + $0x38] sm:$0xff]  }
 0x343   :  { %v789_v49 = vpop.xlane.xlu0 %788  ;;  %v780_v54 = vpop.xlane.xlu1 %779  ;;  %v830_v62 = vmul.f32 %v2653_v55, %v3105_v53  ;;  %v975_v53 = vsel %vm857_vm2, %v3042_v31, 0 }
 0x344   :  { %2666 = vrcp.f32 %v780_v54  ;;  %v2655_v56 = vpop.eup %2654 }
 0x345   :  { %v2657_v58 = vpop.eup %2656  ;;  %v827_v2 = vmul.f32 %v2655_v56, %v3103_v52 }
 0x346   :  { %v829_v8 = vmul.f32 %v2657_v58, %v3097_v41 }
 0x347   :  { %v798_v57 = vpop.xlane.xlu1 %797  ;;  %v801_v60 = vpop.xlane.xlu0 %800 }
 0x348   :  { %2668 = vrcp.f32 %v798_v57  ;;  %v844_v11 = vpack.c.bf16 %v830_v62, %v829_v8 }
 0x349   :  { %v2659_v59 = vpop.eup %2658  ;;  %2670 = vrcp.f32 %v789_v49 }
 0x34a   :  { %v828_v3 = vmul.f32 %v2659_v59, %v3121_v12  ;;  %2672 = vrcp.f32 %v795_v47  ;;  %v2563_v47 = vld [vmem:[#allocation8] sm:$0xff]  }
 0x34b   :  { %v792_v7 = vpop.xlane.xlu1 %791  ;;  %v807_v5 = vpop.xlane.xlu0 %806 }
 0x34c   :  { %v843_v10 = vpack.c.bf16 %v828_v3, %v827_v2  ;;  %2674 = vrcp.f32 %v792_v7 }
 0x34d   :  { %2676 = vrcp.f32 %v801_v60  ;;  %v2661_v1 = vpop.eup %2660 }
 0x34e   :  { %2403 = vmatprep.mubr.msk.bf16.mxu1 %vm666_vm3, %v843_v10  ;;  %v2663_v12 = vpop.eup %2662  ;;  %v834_v14 = vmul.f32 %v2661_v1, %v3127_v17 }
 0x34f   :  { %2404 = vmatmul.mubr.msk.bf16.vlgmr.msra.gmra.mxu1 %vm666_vm3, %v844_v11  ;;  %v804_v52 = vpop.xlane.xlu1 %803  ;;  %v2665_v13 = vpop.eup %2664  ;;  %v831_v16 = vmul.f32 %v2663_v12, %v3117_v4 }
 0x350   :  { %2414 = vmatpush3.bf16.msra.mxu1 %v975_v53  ;;  %2678 = vrcp.f32 %v804_v52  ;;  %v833_v31 = vmul.f32 %v2665_v13, %v3113_v63 }
 0x351   :  { %v2667_v41 = vpop.eup %2666  ;;  %2680 = vrcp.f32 %v807_v5  ;;  %2425 = vmatprep.subr.bf16.mxu1 %v2556_v43 }
 0x352   :  { %v832_v61 = vmul.f32 %v2667_v41, %v3136_v21  ;;  %v846_v19 = vpack.c.bf16 %v834_v14, %v833_v31 }
 0x353   :  { %v810_v15 = vpop.xlane.xlu1 %809 }
 0x354   :  { %2682 = vrcp.f32 %v810_v15  ;;  %v845_v18 = vpack.c.bf16 %v832_v61, %v831_v16 }
 0x355   :  { %v2669_v20 = vpop.eup %2668 }
 0x356   :  { %2409 = vmatprep.mubr.msk.bf16.mxu0 %vm666_vm3, %v845_v18  ;;  %v2671_v23 = vpop.eup %2670  ;;  %v838_v4 = vmul.f32 %v2669_v20, %v3144_v24 }
 0x357   :  { %2410 = vmatmul.mubr.msk.bf16.vlgmr.msra.gmra.mxu0 %vm666_vm3, %v846_v19  ;;  %v2673_v17 = vpop.eup %2672  ;;  %v835_v27 = vmul.f32 %v2671_v23, %v3138_v22 }
 0x358   :  { %2420 = vmatpush3.bf16.msra.mxu0 %v1033_v6  ;;  %v837_v30 = vmul.f32 %v2673_v17, %v3130_v9 }
 0x359   :  { %v2675_v26 = vpop.eup %2674 }
 0x35a   :  { %v2677_v21 = vpop.eup %2676  ;;  %v836_v63 = vmul.f32 %v2675_v26, %v3152_v28  ;;  %v848_v37 = vpack.c.bf16 %v838_v4, %v837_v30 }
 0x35b   :  { %v839_v39 = vmul.f32 %v2677_v21, %v3146_v25  ;;  %v2557_v25 = vld [vmem:[#allocation8 + $0x30] sm:$0xff]  }
 0x35c   :  { %v847_v34 = vpack.c.bf16 %v836_v63, %v835_v27 }
 0x35d   :  { %v2679_v32 = vpop.eup %2678 }
 0x35e   :  { %v840_v38 = vmul.f32 %v2679_v32, %v3160_v33  ;;  %v2681_v40 = vpop.eup %2680  ;;  %2415 = vmatprep.mubr.msk.bf16.mxu1 %vm666_vm3, %v847_v34  ;;  %v2558_v33 = vld [vmem:[#allocation8 + $0x28] sm:$0xff]  }
 0x35f   :  { %2416 = vmatmul.mubr.msk.bf16.vlgmr.msra.gmra.mxu1 %vm666_vm3, %v848_v37  ;;  %v841_v22 = vmul.f32 %v2681_v40, %v3154_v29  ;;  %v2561_v29 = vld [vmem:[#allocation8 + $0x10] sm:$0xff]  }
 0x360   :  { %v849_v24 = vpack.c.bf16 %v840_v38, %v839_v39  ;;  %2426 = vmatpush3.bf16.msra.mxu1 %v2556_v43 }
 0x361   :  { %v2683_v36 = vpop.eup %2682  ;;  %2427 = vmatprep.subr.bf16.mxu1 %v2557_v25 }
 0x362   :  { %2421 = vmatprep.mubr.msk.bf16.mxu0 %vm666_vm3, %v849_v24  ;;  %v842_v9 = vmul.f32 %v2683_v36, %v3164_v35  ;;  %v2562_v35 = vld [vmem:[#allocation8 + $0x8] sm:$0xff]   ;;  %v2151_v24 = vld [vmem:[%s3299_s5] ss:$0 sm:$0xff] }
 0x364   :  { %v850_v28 = vpack.c.bf16 %v842_v9, %v841_v22  ;;  %2428 = vmatpush3.bf16.msra.mxu1 %v2557_v25  ;;  %v2694_v25 = vld [vmem:[#allocation2 + $0x18] sm:$0xff] }
 0x365   :  { %2429 = vmatprep.subr.bf16.mxu1 %v2558_v33 }
 0x366   :  { %2422 = vmatmul.mubr.msk.bf16.vlgmr.msra.gmra.mxu0 %vm666_vm3, %v850_v28  ;;  %v2693_v28 = vld [vmem:[#allocation2] sm:$0xff] }
 0x367   :  { %v3222_v43 = vsel %vm148_vm0, %v2693_v28, 0.0 }
 0x368   :  { %2430 = vmatpush3.bf16.msra.mxu1 %v2558_v33  ;;  %v3225_v33 = vsel %vm148_vm0, %v2694_v25, 0.0 }
 0x369   :  { %2431 = vmatprep.subr.bf16.mxu1 %v2559_v45 }
 0x36c   :  { %2432 = vmatpush3.bf16.msra.mxu1 %v2559_v45 }
 0x36d   :  { %2433 = vmatprep.subr.bf16.mxu1 %v2560_v46 }
 0x370   :  { %2434 = vmatpush3.bf16.msra.mxu1 %v2560_v46 }
 0x371   :  { %2435 = vmatprep.subr.bf16.mxu1 %v2561_v29 }
 0x374   :  { %2436 = vmatpush3.bf16.msra.mxu1 %v2561_v29 }
 0x375   :  { %2437 = vmatprep.subr.bf16.mxu1 %v2562_v35 }
 0x378   :  { %2438 = vmatpush3.bf16.msra.mxu1 %v2562_v35 }
 0x379   :  { %2439 = vmatprep.subr.bf16.mxu1 %v2563_v47 }
 0x37c   :  { %2440 = vmatpush3.bf16.msra.mxu1 %v2563_v47 }
 0x40f   :  { %v2405_v48 = vpop.f32.mrf.mxu1 }
 0x410   :  { %v1086_v3 = vmul.f32 %v2405_v48, %v3022_v50 }
 0x411   :  { %v895_v49 = vpop.f32.mrf.mxu1 }
 0x412   :  { %v1084_v59 = vmul.f32 %v895_v49, %v3016_v42  ;;  %v2695_v49 = vld [vmem:[#allocation2 + $0x8] sm:$0xff] }
 0x413   :  { %v2406_v54 = vpop.f32.mrf.mxu1 }
 0x414   :  { %v1087_v52 = vmul.f32 %v2406_v54, %v3024_v51  ;;  %v3235_v54 = vsel %vm148_vm0, %v2695_v49, 0.0 }
 0x415   :  { %v898_v55 = vpop.f32.mrf.mxu1 }
 0x416   :  { %v1085_v57 = vmul.f32 %v898_v55, %v3018_v44 }
 0x417   :  { %v2411_v56 = vpop.f32.mrf.mxu0 }
 0x418   :  { %v1100_v62 = vadd.f32 %v1085_v57, %v1084_v59  ;;  %v1090_v1 = vmul.f32 %v2411_v56, %v3022_v50 }
 0x419   :  { %v953_v58 = vpop.f32.mrf.mxu0 }
 0x41a   :  { %v1088_v7 = vmul.f32 %v953_v58, %v3016_v42  ;;  %v1104_v11 = vadd.f32 %v1100_v62, %v1086_v3  ;;  %v2565_v62 = vld [vmem:[#allocation10 + $0x30] sm:$0xff]   ;;  %v2567_v3 = vld [vmem:[#allocation10 + $0x20] sm:$0xff]  }
 0x41b   :  { %v2412_v60 = vpop.f32.mrf.mxu0 }
 0x41c   :  { %v1091_v12 = vmul.f32 %v2412_v60, %v3024_v51  ;;  %v1108_v14 = vadd.f32 %v1104_v11, %v1087_v52  ;;  %v2564_v60 = vld [vmem:[#allocation10 + $0x38] sm:$0xff]   ;;  %v2571_v11 = vld [vmem:[#allocation10] sm:$0xff]   ;;  %v2576_v52 = vld [vmem:[#allocation11 + $0x70] sm:$0xff]  }
 0x41d   :  { %v956_v2 = vpop.f32.mrf.mxu0  ;;  %2445 = vmatprep.subr.bf16.mxu0 %v2564_v60 }
 0x41e   :  { %v1089_v8 = vmul.f32 %v956_v2, %v3018_v44  ;;  %2446 = vmatpush3.bf16.msra.mxu0 %v2564_v60  ;;  %v2566_v2 = vld [vmem:[#allocation10 + $0x28] sm:$0xff]  }
 0x41f   :  { %v2417_v10 = vpop.f32.mrf.mxu1  ;;  %2447 = vmatprep.subr.bf16.mxu0 %v2565_v62 }
 0x420   :  { %v1101_v53 = vadd.f32 %v1089_v8, %v1088_v7  ;;  %v1094_v26 = vmul.f32 %v2417_v10, %v3022_v50  ;;  %v2568_v7 = vld [vmem:[#allocation10 + $0x18] sm:$0xff]   ;;  %v2569_v8 = vld [vmem:[#allocation10 + $0x10] sm:$0xff]   ;;  %v2570_v10 = vld [vmem:[#allocation10 + $0x8] sm:$0xff]  }
 0x421   :  { %v1011_v5 = vpop.f32.mrf.mxu1 }
 0x422   :  { %v1105_v13 = vadd.f32 %v1101_v53, %v1090_v1  ;;  %v1092_v20 = vmul.f32 %v1011_v5, %v3016_v42  ;;  %2448 = vmatpush3.bf16.msra.mxu0 %v2565_v62  ;;  %v2572_v1 = vld [vmem:[#allocation11 + $0x78] sm:$0xff]   ;;  %v2161_v62 = vld [vmem:[%s3301_s7] ss:$0 sm:$0xff] }
 0x423   :  { %v2418_v41 = vpop.f32.mrf.mxu1  ;;  %2449 = vmatprep.subr.bf16.mxu0 %v2566_v2  ;;  %v2573_v53 = vld [vmem:[#allocation11 + $0x38] sm:$0xff]   ;;  %2281 = vmatprep.subr.bf16.mxu1 %v2572_v1 }
 0x424   :  { %v1109_v15 = vadd.f32 %v1105_v13, %v1091_v12  ;;  %v1095_v32 = vmul.f32 %v2418_v41, %v3024_v51  ;;  %v2574_v5 = vld [vmem:[#allocation11 + $0xf8] sm:$0xff]   ;;  %v2577_v12 = vld [vmem:[#allocation11 + $0x30] sm:$0xff]   ;;  %v2580_v13 = vld [vmem:[#allocation11 + $0x68] sm:$0xff]  }
 0x425   :  { %v1014_v16 = vpop.f32.mrf.mxu1  ;;  %v2581_v41 = vld [vmem:[#allocation11 + $0x28] sm:$0xff]  }
 0x426   :  { %v2423_v61 = vpop.f32.mrf.mxu0  ;;  %v1093_v31 = vmul.f32 %v1014_v16, %v3018_v44  ;;  %v1112_v18 = vpack.c.bf16 %v1109_v15, %v1108_v14  ;;  %2450 = vmatpush3.bf16.msra.mxu0 %v2566_v2  ;;  %v2584_v14 = vld [vmem:[#allocation11 + $0x60] sm:$0xff]   ;;  %v2588_v16 = vld [vmem:[#allocation11 + $0x58] sm:$0xff]  }
 0x427   :  { %v1098_v63 = vmul.f32 %v2423_v61, %v3022_v50  ;;  %2451 = vmatprep.subr.bf16.mxu0 %v2567_v3  ;;  %v2585_v15 = vld [vmem:[#allocation11 + $0x20] sm:$0xff]  }
 0x428   :  { %v1069_v19 = vpop.f32.mrf.mxu0  ;;  %2441 = vmatprep.mubr.bf16.mxu1 %v1112_v18  ;;  %v1102_v6 = vadd.f32 %v1093_v31, %v1092_v20 }
 0x429   :  { %v1096_v4 = vmul.f32 %v1069_v19, %v3016_v42  ;;  %v2692_v42 = vld [vmem:[#allocation2 + $0x10] sm:$0xff] }
 0x42a   :  { %v2424_v23 = vpop.f32.mrf.mxu0  ;;  %v1106_v27 = vadd.f32 %v1102_v6, %v1094_v26  ;;  %2452 = vmatpush3.bf16.msra.mxu0 %v2567_v3 }
 0x42b   :  { %v1099_v34 = vmul.f32 %v2424_v23, %v3024_v51  ;;  %2453 = vmatprep.subr.bf16.mxu0 %v2568_v7 }
 0x42c   :  { %v1072_v17 = vpop.f32.mrf.mxu0  ;;  %v1110_v39 = vadd.f32 %v1106_v27, %v1095_v32 }
 0x42d   :  { %v1097_v21 = vmul.f32 %v1072_v17, %v3018_v44  ;;  %v3216_v44 = vsel %vm148_vm0, %v2692_v42, 0.0 }
 0x42e   :  { %2454 = vmatpush3.bf16.msra.mxu0 %v2568_v7 }
 0x42f   :  { %v1103_v30 = vadd.f32 %v1097_v21, %v1096_v4  ;;  %2455 = vmatprep.subr.bf16.mxu0 %v2569_v8 }
 0x431   :  { %v1107_v37 = vadd.f32 %v1103_v30, %v1098_v63 }
 0x432   :  { %2456 = vmatpush3.bf16.msra.mxu0 %v2569_v8 }
 0x433   :  { %v1111_v38 = vadd.f32 %v1107_v37, %v1099_v34  ;;  %2457 = vmatprep.subr.bf16.mxu0 %v2570_v10 }
 0x435   :  { %v1113_v40 = vpack.c.bf16 %v1111_v38, %v1110_v39 }
 0x436   :  { %2458 = vmatpush3.bf16.msra.mxu0 %v2570_v10 }
 0x437   :  { %2442 = vmatmul.mubr.bf16.vlgmr.msra.gmra.mxu1 %v1113_v40  ;;  %2459 = vmatprep.subr.bf16.mxu0 %v2571_v11 }
 0x438   :  { %2282 = vmatpush3.bf16.msra.mxu1 %v2573_v53 }
 0x439   :  { %2283 = vmatprep.subr.bf16.mxu1 %v2576_v52  ;;  %v2575_v52 = vld [vmem:[#allocation11 + $0xb8] sm:$0xff]  }
 0x43a   :  { %2460 = vmatpush3.bf16.msra.mxu0 %v2571_v11 }
 0x43b   :  { %2309 = vmatprep.subr.bf16.mxu0 %v2574_v5 }
 0x43c   :  { %2284 = vmatpush3.bf16.msra.mxu1 %v2577_v12 }
 0x43d   :  { %2285 = vmatprep.subr.bf16.mxu1 %v2580_v13  ;;  %v2578_v13 = vld [vmem:[#allocation11 + $0xf0] sm:$0xff]  }
 0x440   :  { %2286 = vmatpush3.bf16.msra.mxu1 %v2581_v41  ;;  %v2579_v41 = vld [vmem:[#allocation11 + $0xb0] sm:$0xff]  }
 0x441   :  { %2287 = vmatprep.subr.bf16.mxu1 %v2584_v14  ;;  %v2582_v14 = vld [vmem:[#allocation11 + $0xe8] sm:$0xff]  }
 0x444   :  { %2288 = vmatpush3.bf16.msra.mxu1 %v2585_v15  ;;  %v2586_v15 = vld [vmem:[#allocation11 + $0xe0] sm:$0xff]  }
 0x445   :  { %2289 = vmatprep.subr.bf16.mxu1 %v2588_v16  ;;  %v2587_v16 = vld [vmem:[#allocation11 + $0xa0] sm:$0xff]  }
 0x4f7   :  { %v2443_v36 = vpop.f32.mrf.mxu1 }
 0x4f8   :  { %v1228_v50 = vadd.f32 %v2443_v36, %v2151_v24 }
 0x4f9   :  { %v1219_v22 = vpop.f32.mrf.mxu1 }
 0x4fa   :  { %v3219_v9 = vadd.f32 %v1228_v50, %v3216_v44  ;;  %v1220_v51 = vadd.f32 %v2151_v24, %v1219_v22 }
 0x4fb   :  { %v2444_v45 = vpop.f32.mrf.mxu1 }
 0x4fc   :  { %v1231_v46 = vadd.f32 %v2444_v45, %v2151_v24  ;;  %1242 = vadd.xlane.f32.xlu0 %v3219_v9  ;;  %v3229_v35 = vadd.f32 %v1220_v51, %v3222_v43  ;;  %v1248_v58 = vmul.f32 %v3219_v9, %v3219_v9 }
 0x4fd   :  { %v1222_v29 = vpop.f32.mrf.mxu1 }
 0x4fe   :  { %v3232_v47 = vadd.f32 %v1231_v46, %v3225_v33  ;;  %v1223_v48 = vadd.f32 %v2151_v24, %v1222_v29  ;;  %v1246_v56 = vmul.f32 %v3229_v35, %v3229_v35 }
 0x500   :  { %1244 = vadd.xlane.f32.xlu1 %v3232_v47  ;;  %1238 = vadd.xlane.f32.xlu0 %v3229_v35  ;;  %v3240_v55 = vadd.f32 %v1223_v48, %v3235_v54  ;;  %v1249_v59 = vmul.f32 %v3232_v47, %v3232_v47  ;;  %v2160_v48 = vld [vmem:[%s3300_s6] ss:$0 sm:$0xff] }
 0x502   :  { %v1247_v57 = vmul.f32 %v3240_v55, %v3240_v55 }
 0x504   :  { %1240 = vadd.xlane.f32.xlu1 %v3240_v55  ;;  %1250 = vadd.xlane.f32.xlu0 %v1246_v56 }
 0x508   :  { %1252 = vadd.xlane.f32.xlu1 %v1247_v57  ;;  %1254 = vadd.xlane.f32.xlu0 %v1248_v58 }
 0x50c   :  { %1256 = vadd.xlane.f32.xlu1 %v1249_v59 }
 0x585   :  { %v1243_v61 = vpop.xlane.xlu0 %1242 }
 0x586   :  { %v1260_v20 = vmul.f32 0.03125, %v1243_v61  ;;  %v2589_v61 = vld [vmem:[#allocation11 + $0x18] sm:$0xff]  }
 0x587   :  { %2290 = vmatpush3.bf16.msra.mxu1 %v2589_v61 }
 0x588   :  { %v1268_v27 = vmul.f32 %v1260_v20, %v1260_v20  ;;  %v1276_v57 = vsub.f32 %v3219_v9, %v1260_v20  ;;  %v2593_v20 = vld [vmem:[#allocation11 + $0x10] sm:$0xff]  }
 0x589   :  { %v1245_v31 = vpop.xlane.xlu1 %1244  ;;  %v1239_v18 = vpop.xlane.xlu0 %1238 }
 0x58a   :  { %v1258_v19 = vmul.f32 0.03125, %v1239_v18  ;;  %v1261_v63 = vmul.f32 0.03125, %v1245_v31  ;;  %v2590_v31 = vld [vmem:[#allocation11 + $0xd8] sm:$0xff]  }
 0x58b   :  { %v2591_v18 = vld [vmem:[#allocation11 + $0x98] sm:$0xff]  }
 0x58c   :  { %v1266_v17 = vmul.f32 %v1258_v19, %v1258_v19  ;;  %v1269_v36 = vmul.f32 %v1261_v63, %v1261_v63  ;;  %v1274_v45 = vsub.f32 %v3229_v35, %v1258_v19  ;;  %v1277_v35 = vsub.f32 %v3232_v47, %v1261_v63  ;;  %v2583_v47 = vld [vmem:[#allocation11 + $0xa8] sm:$0xff]   ;;  %v2592_v19 = vld [vmem:[#allocation11 + $0x50] sm:$0xff]   ;;  %v2601_v63 = vld [vmem:[#allocation11] sm:$0xff]  }
 0x58d   :  { %v1241_v23 = vpop.xlane.xlu1 %1240  ;;  %v1251_v6 = vpop.xlane.xlu0 %1250  ;;  %2291 = vmatprep.subr.bf16.mxu1 %v2592_v19 }
 0x58e   :  { %v1259_v26 = vmul.f32 0.03125, %v1241_v23  ;;  %v1262_v4 = vmul.f32 0.03125, %v1251_v6  ;;  %v2594_v23 = vld [vmem:[#allocation11 + $0xd0] sm:$0xff]   ;;  %2292 = vmatpush3.bf16.msra.mxu1 %v2593_v20 }
 0x58f   :  { %v2595_v6 = vld [vmem:[#allocation11 + $0x90] sm:$0xff]  }
 0x590   :  { %v1270_v21 = vsub.f32 %v1262_v4, %v1266_v17  ;;  %v1267_v34 = vmul.f32 %v1259_v26, %v1259_v26  ;;  %v1275_v49 = vsub.f32 %v3240_v55, %v1259_v26  ;;  %v2596_v17 = vld [vmem:[#allocation11 + $0x48] sm:$0xff]  }
 0x591   :  { %v1253_v30 = vpop.xlane.xlu1 %1252  ;;  %v1255_v32 = vpop.xlane.xlu0 %1254  ;;  %v2597_v26 = vld [vmem:[#allocation11 + $0x8] sm:$0xff]   ;;  %2293 = vmatprep.subr.bf16.mxu1 %v2596_v17 }
 0x592   :  { %v1278_v37 = vadd.f32 1e-05, %v1270_v21  ;;  %v1263_v39 = vmul.f32 0.03125, %v1253_v30  ;;  %v1264_v38 = vmul.f32 0.03125, %v1255_v32  ;;  %v2598_v4 = vld [vmem:[#allocation11 + $0xc8] sm:$0xff]   ;;  %2294 = vmatpush3.bf16.msra.mxu1 %v2597_v26  ;;  %v2602_v30 = vld [vmem:[#allocation11 + $0xc0] sm:$0xff]  }
 0x593   :  { %v2599_v21 = vld [vmem:[#allocation11 + $0x88] sm:$0xff]   ;;  %v2603_v32 = vld [vmem:[#allocation11 + $0x80] sm:$0xff]  }
 0x594   :  { %2684 = vrsqrt.f32 %v1278_v37  ;;  %v1271_v40 = vsub.f32 %v1263_v39, %v1267_v34  ;;  %v1272_v24 = vsub.f32 %v1264_v38, %v1268_v27  ;;  %v2600_v27 = vld [vmem:[#allocation11 + $0x40] sm:$0xff]   ;;  %v2604_v34 = vld [vmem:[#allocation11 + $0x138] sm:$0xff]  }
 0x595   :  { %v1257_v42 = vpop.xlane.xlu1 %1256  ;;  %2295 = vmatprep.subr.bf16.mxu1 %v2600_v27  ;;  %v2162_v39 = vld [vmem:[%s3303_s9] ss:$0 sm:$0xff] }
 0x596   :  { %v1279_v50 = vadd.f32 1e-05, %v1271_v40  ;;  %v1280_v22 = vadd.f32 1e-05, %v1272_v24  ;;  %v1265_v51 = vmul.f32 0.03125, %v1257_v42  ;;  %2296 = vmatpush3.bf16.msra.mxu1 %v2601_v63 }
 0x597   :  { %2465 = vmatprep.subr.bf16.mxu1 %v2604_v34 }
 0x598   :  { %2686 = vrsqrt.f32 %v1279_v50  ;;  %v1273_v28 = vsub.f32 %v1265_v51, %v1269_v36 }
 0x599   :  { %2688 = vrsqrt.f32 %v1280_v22 }
 0x59a   :  { %v1281_v25 = vadd.f32 1e-05, %v1273_v28 }
 0x59c   :  { %2690 = vrsqrt.f32 %v1281_v25 }
 0x5a1   :  { %v2685_v46 = vpop.eup %2684 }
 0x5a2   :  { %v1286_v29 = vmul.f32 %v2685_v46, %v1274_v45 }
 0x5a4   :  { %v1297_v60 = vmul.f32 %v2160_v48, %v1286_v29 }
 0x5a5   :  { %v2687_v56 = vpop.eup %2686 }
 0x5a6   :  { %v2689_v58 = vpop.eup %2688  ;;  %v1287_v59 = vmul.f32 %v2687_v56, %v1275_v49  ;;  %v1308_v8 = vadd.f32 %v2161_v62, %v1297_v60  ;;  %v2605_v56 = vld [vmem:[#allocation11 + $0x130] sm:$0xff]   ;;  %v2608_v60 = vld [vmem:[#allocation11 + $0x118] sm:$0xff]  }
 0x5a7   :  { %v1288_v2 = vmul.f32 %v2689_v58, %v1276_v57  ;;  %v2606_v58 = vld [vmem:[#allocation11 + $0x128] sm:$0xff]  }
 0x5a8   :  { %v1298_v3 = vmul.f32 %v2160_v48, %v1287_v59  ;;  %v2607_v59 = vld [vmem:[#allocation11 + $0x120] sm:$0xff]  }
 0x5a9   :  { %v2691_v7 = vpop.eup %2690  ;;  %v1299_v1 = vmul.f32 %v2160_v48, %v1288_v2  ;;  %v2610_v2 = vld [vmem:[#allocation11 + $0x108] sm:$0xff]  }
 0x5aa   :  { %v1309_v10 = vadd.f32 %v2161_v62, %v1298_v3  ;;  %v1289_v11 = vmul.f32 %v2691_v7, %v1277_v35  ;;  %v2611_v35 = vld [vmem:[#allocation11 + $0x100] sm:$0xff]   ;;  %v2612_v3 = vld [vmem:[#allocation13 + $0x38] sm:$0xff]   ;;  %v2613_v7 = vld [vmem:[#allocation13 + $0x30] sm:$0xff]  }
 0x5ab   :  { %v1310_v9 = vadd.f32 %v2161_v62, %v1299_v1  ;;  %v2617_v1 = vld [vmem:[#allocation13 + $0x10] sm:$0xff]  }
 0x5ac   :  { %v1312_v55 = vpack.c.bf16 %v1309_v10, %v1308_v8  ;;  %v1300_v53 = vmul.f32 %v2160_v48, %v1289_v11  ;;  %v2614_v8 = vld [vmem:[#allocation13 + $0x28] sm:$0xff]   ;;  %v2615_v10 = vld [vmem:[#allocation13 + $0x20] sm:$0xff]   ;;  %v2616_v11 = vld [vmem:[#allocation13 + $0x18] sm:$0xff]  }
 0x5ae   :  { %2461 = vmatprep.mubr.bf16.mxu0 %v1312_v55  ;;  %v1311_v5 = vadd.f32 %v2161_v62, %v1300_v53  ;;  %v2609_v62 = vld [vmem:[#allocation11 + $0x110] sm:$0xff]   ;;  %v2618_v55 = vld [vmem:[#allocation13 + $0x8] sm:$0xff]  }
 0x5b0   :  { %v1313_v12 = vpack.c.bf16 %v1311_v5, %v1310_v9 }
 0x5b2   :  { %2462 = vmatmul.mubr.bf16.vlgmr.msra.gmra.mxu0 %v1313_v12 }
 0x5b3   :  { %2310 = vmatpush3.bf16.msra.mxu0 %v2575_v52 }
 0x5b4   :  { %2311 = vmatprep.subr.bf16.mxu0 %v2578_v13 }
 0x5b7   :  { %2312 = vmatpush3.bf16.msra.mxu0 %v2579_v41 }
 0x5b8   :  { %2313 = vmatprep.subr.bf16.mxu0 %v2582_v14 }
 0x5bb   :  { %2314 = vmatpush3.bf16.msra.mxu0 %v2583_v47 }
 0x5bc   :  { %2315 = vmatprep.subr.bf16.mxu0 %v2586_v15 }
 0x5bf   :  { %2316 = vmatpush3.bf16.msra.mxu0 %v2587_v16 }
 0x5c0   :  { %2317 = vmatprep.subr.bf16.mxu0 %v2590_v31 }
 0x5c3   :  { %2318 = vmatpush3.bf16.msra.mxu0 %v2591_v18 }
 0x5c4   :  { %2319 = vmatprep.subr.bf16.mxu0 %v2594_v23 }
 0x5c7   :  { %2320 = vmatpush3.bf16.msra.mxu0 %v2595_v6 }
 0x5c8   :  { %2321 = vmatprep.subr.bf16.mxu0 %v2598_v4 }
 0x5cb   :  { %2322 = vmatpush3.bf16.msra.mxu0 %v2599_v21 }
 0x5cc   :  { %2323 = vmatprep.subr.bf16.mxu0 %v2602_v30 }
 0x5cf   :  { %2324 = vmatpush3.bf16.msra.mxu0 %v2603_v32 }
 0x5d0   :  { %2485 = vmatprep.subr.bf16.mxu0 %v2612_v3 }
 0x672   :  { %v2463_v37 = vpop.f32.mrf.mxu0 }
 0x673   :  { %v1428_v40 = vadd.f32 %v2463_v37, %v2162_v39 }
 0x674   :  { %v1419_v38 = vpop.f32.mrf.mxu0 }
 0x675   :  { %v1420_v42 = vadd.f32 %v2162_v39, %v1419_v38  ;;  %v1436_v22 = vmax.f32 %v1428_v40, 0.0 }
 0x676   :  { %v2464_v24 = vpop.f32.mrf.mxu0 }
 0x677   :  { %v1431_v36 = vadd.f32 %v2464_v24, %v2162_v39  ;;  %v1434_v25 = vmax.f32 %v1420_v42, 0.0  ;;  %v2214_v24 = vld [vmem:[%s3305_s11] ss:$0 sm:$0xff] }
 0x678   :  { %v1422_v50 = vpop.f32.mrf.mxu0 }
 0x679   :  { %v1437_v51 = vmax.f32 %v1431_v36, 0.0  ;;  %v1423_v28 = vadd.f32 %v2162_v39, %v1422_v50  ;;  %v2217_v36 = vld [vmem:[%s3305_s11 + $0x3] ss:$0 sm:$0xff]  ;;  %v2216_v50 = vld [vmem:[%s3305_s11 + $0x2] ss:$0 sm:$0xff] }
 0x67b   :  { %v1439_v45 = vpack.c.bf16 %v1437_v51, %v1436_v22  ;;  %v1435_v46 = vmax.f32 %v1423_v28, 0.0 }
 0x67d   :  { %v1438_v29 = vpack.c.bf16 %v1435_v46, %v1434_v25  ;;  %v1444_v49 = vrot.slane %v1439_v45, 4  ;;  %v2215_v25 = vld [vmem:[%s3305_s11 + $0x1] ss:$0 sm:$0xff]  ;;  %s2880_s11 = smov [#allocation14]  }
 0x67e   :  { %s2092_s29 = sshll.u32 %s2880_s11, 4  ;;  %s2093_s29 = int_to_ptr.vmem [resolvable:$true] %s2092_s29 }
 0x67f   :  { %v1443_v48 = vrot.slane %v1438_v29, 4  ;;  %p2841_p8 = scmp.lt.s32.totalorder %s2093_s29, %s2093_s29 }
 0x681   :  { %2212 = vmatprep.mubr.msk.bf16.mxu1 %vm2211_vm4, %v1443_v48  ;;  %v1445_v57 = vsel %vm857_vm2, %v1443_v48, %v1444_v49 }
 0x682   :  { %1807 = vmatmul.mubr.bf16.vlgmr.msra.gmra.mxu1 %v2879_v0  ;;  %1855 = vmatprep.mubr.bf16.mxu0 %v1445_v57 }
 0x683   :  { %2466 = vmatpush3.bf16.msra.mxu1 %v2604_v34  ;;  %1814 = vmatprep.mubr.bf16.mxu1 %v1445_v57 }
 0x684   :  { %1856 = vmatmul.mubr.bf16.vlgmr.msra.gmra.mxu0 %v1438_v29  ;;  %2467 = vmatprep.subr.bf16.mxu1 %v2605_v56 }
 0x685   :  { %2213 = vmatprep.mubr.msk.bf16.mxu0 %vm857_vm2, %v1444_v49  ;;  %2486 = vmatpush3.bf16.msra.mxu0 %v2612_v3 }
 0x686   :  { %2487 = vmatprep.subr.bf16.mxu0 %v2613_v7 }
 0x687   :  { %2468 = vmatpush3.bf16.msra.mxu1 %v2605_v56 }
 0x688   :  { %2469 = vmatprep.subr.bf16.mxu1 %v2606_v58 }
 0x689   :  { %2488 = vmatpush3.bf16.msra.mxu0 %v2613_v7 }
 0x68a   :  { %1815 = vmatmul.mubr.bf16.gmra.mxu1 %v1438_v29  ;;  %2489 = vmatprep.subr.bf16.mxu0 %v2614_v8 }
 0x68b   :  { %2470 = vmatpush3.bf16.msra.mxu1 %v2606_v58  ;;  %2481 = vmatprep.mubr.bf16.mxu1 %v1439_v45 }
 0x68c   :  { %1864 = vmatmul.mubr.bf16.gmra.mxu0 %v1439_v45  ;;  %2471 = vmatprep.subr.bf16.mxu1 %v2607_v59 }
 0x68d   :  { %2490 = vmatpush3.bf16.msra.mxu0 %v2614_v8 }
 0x68e   :  { %2491 = vmatprep.subr.bf16.mxu0 %v2615_v10 }
 0x68f   :  { %2472 = vmatpush3.bf16.msra.mxu1 %v2607_v59 }
 0x690   :  { %2473 = vmatprep.subr.bf16.mxu1 %v2608_v60 }
 0x691   :  { %2492 = vmatpush3.bf16.msra.mxu0 %v2615_v10 }
 0x692   :  { %2493 = vmatprep.subr.bf16.mxu0 %v2616_v11 }
 0x693   :  { %2474 = vmatpush3.bf16.msra.mxu1 %v2608_v60 }
 0x694   :  { %2475 = vmatprep.subr.bf16.mxu1 %v2609_v62 }
 0x695   :  { %2494 = vmatpush3.bf16.msra.mxu0 %v2616_v11 }
 0x696   :  { %2495 = vmatprep.subr.bf16.mxu0 %v2617_v1 }
 0x697   :  { %2476 = vmatpush3.bf16.msra.mxu1 %v2609_v62 }
 0x698   :  { %2477 = vmatprep.subr.bf16.mxu1 %v2610_v2 }
 0x699   :  { %2496 = vmatpush3.bf16.msra.mxu0 %v2617_v1 }
 0x69a   :  { %2497 = vmatprep.subr.bf16.mxu0 %v2618_v55 }
 0x69b   :  { %2478 = vmatpush3.bf16.msra.mxu1 %v2610_v2  ;;  %v2218_v2 = vld [vmem:[%s3307_s13] ss:$0 sm:$0xff]  ;;  %s2836_s13 = scalar_lea.vmem %s2093_s29, 512 }
 0x69c   :  { %2479 = vmatprep.subr.bf16.mxu1 %v2611_v35  ;;  %p2837_p7 = scmp.ne.s32.totalorder %s2093_s29, %s2836_s13  ;;  %p2842_p9 = scmp.lt.s32.totalorder %s2836_s13, %s2836_s13 }
 0x69d   :  { %2498 = vmatpush3.bf16.msra.mxu0 %v2618_v55 }
 0x69e   :  { %p2843_p10 = por %p2842_p9, %p2841_p8 }
 0x69f   :  { %2480 = vmatpush3.bf16.msra.mxu1 %v2611_v35 }
 0x6a0   :  { %p2844_p11 = pnand %p2843_p10, %p2837_p7 }
 0x6a2   :  { %2482 = vmatmul.mubr.bf16.vlgmr.msra.gmra.mxu1 %v2879_v0  ;;  %v2619_v0 = vld [vmem:[#allocation13] sm:$0xff]  }
 0x6a3   :  { %2499 = vmatprep.subr.bf16.mxu0 %v2619_v0 }
 0x6a4   :  { %2500 = vmatpush3.bf16.msra.mxu0 %v2619_v0 }
 0x742   :  { %v2297_v53 = vpop.f32.mrf.mxu1 }
 0x744   :  { %v2325_v9 = vpop.f32.mrf.mxu0  ;;  %v2298_v5 = vpop.f32.mrf.mxu1 }
 0x745   :  { %v2299_v23 = vadd.f32 %v2298_v5, %v2297_v53 }
 0x746   :  { %v2326_v52 = vpop.f32.mrf.mxu0  ;;  %v2300_v12 = vpop.f32.mrf.mxu1 }
 0x747   :  { %v2327_v6 = vadd.f32 %v2326_v52, %v2325_v9 }
 0x748   :  { %v2328_v13 = vpop.f32.mrf.mxu0  ;;  %v2301_v41 = vpop.f32.mrf.mxu1 }
 0x749   :  { %v2302_v63 = vadd.f32 %v2301_v41, %v2300_v12  ;;  %v1858_v32 = vadd.f32 %v2327_v6, %v2299_v23 }
 0x74a   :  { %v2329_v14 = vpop.f32.mrf.mxu0  ;;  %v2303_v47 = vpop.f32.mrf.mxu1 }
 0x74b   :  { %v2330_v30 = vadd.f32 %v2329_v14, %v2328_v13 }
 0x74c   :  { %v2331_v15 = vpop.f32.mrf.mxu0  ;;  %v2304_v16 = vpop.f32.mrf.mxu1 }
 0x74d   :  { %v2305_v17 = vadd.f32 %v2304_v16, %v2303_v47  ;;  %v1861_v51 = vadd.f32 %v2330_v30, %v2302_v63 }
 0x74e   :  { %v2332_v61 = vpop.f32.mrf.mxu0  ;;  %v2306_v31 = vpop.f32.mrf.mxu1 }
 0x74f   :  { %v2333_v26 = vadd.f32 %v2332_v61, %v2331_v15 }
 0x750   :  { %v2334_v18 = vpop.f32.mrf.mxu0  ;;  %v2307_v19 = vpop.f32.mrf.mxu1 }
 0x751   :  { %v2308_v4 = vadd.f32 %v2307_v19, %v2306_v31  ;;  %v1866_v34 = vadd.f32 %v2333_v26, %v2305_v17 }
 0x752   :  { %v2335_v20 = vpop.f32.mrf.mxu0 }
 0x753   :  { %v2336_v21 = vadd.f32 %v2335_v20, %v2334_v18 }
 0x755   :  { %v1869_v38 = vadd.f32 %v2336_v21, %v2308_v4 }
 0x762   :  { %v2483_v27 = vpop.f32.mrf.mxu1 }
 0x763   :  { %v1915_v40 = vadd.f32 %v2483_v27, %v1866_v34 }
 0x764   :  { %v1906_v37 = vpop.f32.mrf.mxu1 }
 0x765   :  { %v1907_v39 = vadd.f32 %v1906_v37, %v1858_v32  ;;  %v1951_v48 = vadd.f32 %v2216_v50, %v1915_v40 }
 0x766   :  { %v2484_v42 = vpop.f32.mrf.mxu1 }
 0x767   :  { %v1918_v22 = vadd.f32 %v2484_v42, %v1869_v38  ;;  %v1949_v45 = vadd.f32 %v2214_v24, %v1907_v39  ;;  %v1955_v59 = vmax.f32 %v1951_v48, 0.0 }
 0x768   :  { %v1909_v28 = vpop.f32.mrf.mxu1 }
 0x769   :  { %v1952_v46 = vadd.f32 %v2217_v36, %v1918_v22  ;;  %v1910_v29 = vadd.f32 %v1909_v28, %v1861_v51  ;;  %v1953_v57 = vmax.f32 %v1949_v45, 0.0 }
 0x76b   :  { %v1950_v49 = vadd.f32 %v2215_v25, %v1910_v29  ;;  %v1956_v56 = vmax.f32 %v1952_v46, 0.0 }
 0x76d   :  { %v1954_v58 = vmax.f32 %v1950_v49, 0.0  ;;  %v1958_v62 = vpack.c.bf16 %v1956_v56, %v1955_v59 }
 0x76f   :  { %v1957_v60 = vpack.c.bf16 %v1954_v58, %v1953_v57 }
 0x771   :  { %2501 = vmatprep.mubr.bf16.mxu0 %v1957_v60 }
 0x772   :  { %2502 = vmatmul.mubr.bf16.vlgmr.msra.gmra.mxu0 %v1958_v62 }
 0x832   :  { %v2503_v35 = vpop.f32.mrf.mxu0 }
 0x833   :  { %v2073_v3 = vadd.f32 %v2503_v35, %v2218_v2 }
 0x834   :  { %v2064_v7 = vpop.f32.mrf.mxu0 }
 0x835   :  { %v2081_v8 = vadd.f32 %v2073_v3, %v3216_v44  ;;  %v2065_v10 = vadd.f32 %v2218_v2, %v2064_v7 }
 0x836   :  { %v2504_v11 = vpop.f32.mrf.mxu0 }
 0x837   :  { %2085 = vst [vmem:[#allocation14 + $0x10] sm:$0xff] %v2081_v8  ;;  %v2079_v1 = vadd.f32 %v2065_v10, %v3222_v43  ;;  %v2076_v55 = vadd.f32 %v2504_v11, %v2218_v2 }
 0x838   :  { %v2067_v0 = vpop.f32.mrf.mxu0 }
 0x839   :  { %2083 = vst [vmem:[#allocation14] sm:$0xff] %v2079_v1  ;;  %v2082_v53 = vadd.f32 %v2076_v55, %v3225_v33  ;;  %v2068_v9 = vadd.f32 %v2218_v2, %v2067_v0 }
 0x83b   :  { %2086 = vst [vmem:[#allocation14 + $0x18] sm:$0xff] %v2082_v53  ;;  %v2080_v5 = vadd.f32 %v2068_v9, %v3235_v54 }
 0x83d   :  { %2084 = vst [vmem:[#allocation14 + $0x8] sm:$0xff] %v2080_v5 }
 0x83e   :  { %2847 = shalt.err (!%p2844_p11)
}
 0x83f   :  { %2098 = dma.vmem_to_hbm [thread:$0]  %s2093_s29, 512, %s3308_s14, [#allocation4], %s2874_s17, %s2874_s17, %s2875_s18  }
 0x840   :  { %2864 = dma.done.wait [#allocation4], 512  }
 0x841   :  { %2865 = vsyncadd [#allocation4], 4294966784 }
 0x842   :  { %2102 = vsyncpa [#allocation3], 1 }
 0x843   :  { %2103 = vsyncpa [#allocation6], 1 }
 0x844   :  { %2104 = vsyncpa [#allocation9], 1 }
 0x845   :  { %2105 = vsyncpa [#allocation12], 1 }
 0x846   :  { %2106 = vsyncpa [#allocation4], 1 }

</bundles_post_ra>
